<compile_context>
chip_gen: v6e
topology: v6e:2x2x1
jax: 0.10.0
libtpu: 0.0.40
codegen_flags: <defaults>
</compile_context>

<pallas_src>
import functools

import jax
import jax.numpy as jnp
from jax import lax
from jax.experimental import pallas as pl
from jax.experimental.pallas import tpu as pltpu

START_TAG = "<START>"
STOP_TAG = "<STOP>"


# ----------------------------------------------------------------------------
# Fused kernel: BiLSTM (1 layer, batch=1) + hidden2tag + CRF Viterbi decode
# ----------------------------------------------------------------------------
def _bilstm_crf_kernel(embeds_ref,        # (S, E)
                       slab_a_ref,        # (E + 2H + 3, 8H)  LSTM params
                       slab_b_ref,        # (2H + 1 + 2T, T)  hidden2tag + CRF params
                       score_ref,         # out (1, 1) f32
                       path_ref,          # out (1, S) i32
                       *, start_idx, stop_idx):
    f32 = jnp.float32
    S, E = embeds_ref.shape
    H8 = slab_a_ref.shape[1]
    H = H8 // 8
    H2 = 2 * H
    T = slab_b_ref.shape[1]

    # ---- unpack parameter slabs (static slices; whole slab arrives in one DMA) ----
    wih = slab_a_ref[0:E, :]                                   # (E, 8H) input -> gates
    whh = slab_a_ref[E:E + H2, :]                              # (2H, 8H) block-diag h -> gates
    bias = slab_a_ref[E + H2:E + H2 + 1, :]                    # (1, 8H)
    h_cat = slab_a_ref[E + H2 + 1:E + H2 + 2, :][:, 0:H2]      # (1, 2H) = [h0_f | h0_b]
    c_cat = slab_a_ref[E + H2 + 2:E + H2 + 3, :][:, 0:H2]      # (1, 2H) = [c0_f | c0_b]

    wout = slab_b_ref[0:H2, :]                                 # (2H, T)
    bout = slab_b_ref[H2:H2 + 1, :]                            # (1, T)
    trans = slab_b_ref[H2 + 1:H2 + 1 + T, :]                   # (T, T)  trans[next, prev]
    trans_t = slab_b_ref[H2 + 1 + T:H2 + 1 + 2 * T, :]         # (T, T)  trans.T [prev, next]

    # ---------------- BiLSTM ----------------
    # Input projection for BOTH directions as one (S,E)@(E,8H=128) matmul.
    x_all = jnp.dot(embeds_ref[...], wih, preferred_element_type=f32) + bias   # (S, 8H)

    # Fused gate lane layout (each block H wide):
    #   [ i_f | i_b | f_f | f_b | o_f | o_b | g_f | g_b ]
    # forward gates sit in even H-blocks, backward gates in odd H-blocks.
    lane8 = lax.broadcasted_iota(jnp.int32, (1, H8), 1)
    fwd_mask = ((lane8 < H)
                | ((lane8 >= 2 * H) & (lane8 < 3 * H))
                | ((lane8 >= 4 * H) & (lane8 < 5 * H))
                | ((lane8 >= 6 * H) & (lane8 < 7 * H)))

    # Hidden-state assembly masks (vreg-resident, no VMEM scratch).
    sub_S2H = lax.broadcasted_iota(jnp.int32, (S, H2), 0)
    fwd_half = lax.broadcasted_iota(jnp.int32, (S, H2), 1) < H
    h_all = jnp.zeros((S, H2), f32)                            # row p = [h_f(p) | h_b(p)]

    # Interleaved forward/backward recurrence, fully unrolled.
    for t in range(S):
        tb = S - 1 - t
        # forward lanes take x[t], backward lanes take x[S-1-t]
        x_step = jnp.where(fwd_mask, x_all[t:t + 1, :], x_all[tb:tb + 1, :])   # (1, 8H)
        g = x_step + jnp.dot(h_cat, whh, preferred_element_type=f32)           # (1, 8H)
        sig = jax.nn.sigmoid(g[:, 0:6 * H])         # [i_f,i_b | f_f,f_b | o_f,o_b]
        i_cat = sig[:, 0:H2]
        f_cat = sig[:, H2:2 * H2]
        o_cat = sig[:, 2 * H2:3 * H2]
        g_cat = jnp.tanh(g[:, 6 * H:8 * H])         # [g_f | g_b]
        c_cat = f_cat * c_cat + i_cat * g_cat
        h_cat = o_cat * jnp.tanh(c_cat)             # (1, 2H) = [h_f(t) | h_b(tb)]
        # scatter into the (S, 2H) vreg-resident hidden matrix (off the h/c chain)
        put = (fwd_half & (sub_S2H == t)) | ((~fwd_half) & (sub_S2H == tb))
        h_all = jnp.where(put, h_cat, h_all)

    # hidden2tag: single (S,2H)@(2H,T) matmul.
    feats = jnp.dot(h_all, wout, preferred_element_type=f32) + bout            # (S, T)

    # ---------------- CRF Viterbi decode ----------------
    lane_1T = lax.broadcasted_iota(jnp.int32, (1, T), 1)
    sub_T1 = lax.broadcasted_iota(jnp.int32, (T, 1), 0)
    lane_TT = lax.broadcasted_iota(jnp.int32, (T, T), 1)
    sub_TT = lax.broadcasted_iota(jnp.int32, (T, T), 0)
    eye_TT = sub_TT == lane_TT

    # Emission columns (feat[t] as a (T,1) column), precomputed OFF the serial chain.
    feat_cols = []
    for t in range(S):
        fr = feats[t:t + 1, :]
        feat_cols.append(jnp.sum(jnp.where(eye_TT, fr, f32(0.0)),
                                 axis=1, keepdims=True))                       # (T, 1)

    neg = f32(-10000.0)
    # init_vvars: -10000 everywhere except START = 0 (matches PyTorch reference),
    # kept in BOTH layouts so no relayout sits on the per-step dependence chain.
    fv_row = jnp.where(lane_1T == start_idx, f32(0.0), neg)                    # (1, T)
    fv_col = jnp.where(sub_T1 == start_idx, f32(0.0), neg)                     # (T, 1)

    bp_rows = []    # backpointers as vreg-resident (1,T) i32 rows
    for t in range(S):
        # row chain: consumes previous column layout (sublane max-reduce)
        scores_r = fv_col + trans_t                        # [prev, next] = fv[j] + trans[k,j]
        m_row = jnp.max(scores_r, axis=0, keepdims=True)   # (1, T)
        bp_rows.append(jnp.min(jnp.where(scores_r == m_row, sub_TT, T),
                               axis=0, keepdims=True))     # (1, T) first argmax (off-chain)
        # column chain: consumes previous row layout (lane max-reduce)
        scores_c = fv_row + trans                          # [next, prev]
        m_col = jnp.max(scores_c, axis=1, keepdims=True)   # (T, 1)
        fv_row = m_row + feats[t:t + 1, :]
        fv_col = m_col + feat_cols[t]

    terminal = fv_row + trans[stop_idx:stop_idx + 1, :]                        # (1, T)
    score = jnp.max(terminal, axis=1, keepdims=True)                           # (1, 1)
    best = jnp.min(jnp.where(terminal == score, lane_1T, T),
                   axis=1, keepdims=True)                                      # (1, 1) i32
    score_ref[...] = score

    # Backtrace entirely in the vector domain: (1,1) index + (1,T) one-hot,
    # keepdims lane-reduce per step, no scalar extraction / sreg round trip.
    s_iota = lax.broadcasted_iota(jnp.int32, (1, S), 1)
    path = jnp.zeros((1, S), jnp.int32)
    cur_idx = best
    cur_oh = lane_1T == cur_idx
    for j in range(S):
        t = S - 1 - j
        path = jnp.where(s_iota == t, cur_idx, path)
        cur_idx = jnp.sum(jnp.where(cur_oh, bp_rows[t], 0), axis=1, keepdims=True)
        cur_oh = lane_1T == cur_idx
    path_ref[...] = path


# ----------------------------------------------------------------------------
# Wrapper: parameter slab packing + pallas_call plumbing
# ----------------------------------------------------------------------------
def _pack_params(params):
    """Repack per-direction [i|f|g|o] LSTM params + CRF params into two
    lane-aligned slabs so the kernel sees 3 DMAs instead of 15."""
    f32 = jnp.float32
    E, H4 = params["wih_f"].shape
    H = H4 // 4

    def split(w):   # (X, 4H), PyTorch gate order i, f, g, o -> four (X, H) blocks
        return w[:, 0:H], w[:, H:2 * H], w[:, 2 * H:3 * H], w[:, 3 * H:4 * H]

    # fused lane order: [i_f, i_b, f_f, f_b, o_f, o_b, g_f, g_b]
    i_f, f_f, g_f, o_f = split(params["wih_f"])
    i_b, f_b, g_b, o_b = split(params["wih_b"])
    wih_cat = jnp.concatenate([i_f, i_b, f_f, f_b, o_f, o_b, g_f, g_b], axis=1)

    ri_f, rf_f, rg_f, ro_f = split(params["whh_f"])
    ri_b, rf_b, rg_b, ro_b = split(params["whh_b"])
    z = jnp.zeros((H, H), f32)
    whh_cat = jnp.concatenate([
        jnp.concatenate([ri_f, z, rf_f, z, ro_f, z, rg_f, z], axis=1),
        jnp.concatenate([z, ri_b, z, rf_b, z, ro_b, z, rg_b], axis=1)], axis=0)  # (2H,8H)

    bi_f, bf_f, bg_f, bo_f = split(params["b_f"])
    bi_b, bf_b, bg_b, bo_b = split(params["b_b"])
    b_cat = jnp.concatenate([bi_f, bi_b, bf_f, bf_b, bo_f, bo_b, bg_f, bg_b], axis=1)

    def pad8h(x):
        return jnp.pad(x, ((0, 0), (0, 8 * H - x.shape[1])))

    h0 = pad8h(jnp.concatenate([params["h0_f"], params["h0_b"]], axis=1))
    c0 = pad8h(jnp.concatenate([params["c0_f"], params["c0_b"]], axis=1))
    slab_a = jnp.concatenate([wih_cat, whh_cat, b_cat, h0, c0], axis=0).astype(f32)

    wout = jnp.concatenate([params["wout_f"], params["wout_b"]], axis=0)       # (2H, T)
    trans = params["transitions"]
    slab_b = jnp.concatenate([wout, params["bout"], trans, trans.T],
                             axis=0).astype(f32)                               # (2H+1+2T, T)
    return slab_a, slab_b


def bilstm_crf_forward(sentence, params, *, start_idx, stop_idx):
    embeds = params["embedding"][sentence].astype(jnp.float32)   # (S, E) gather = glue
    slab_a, slab_b = _pack_params(params)
    S = embeds.shape[0]
    vmem = pl.BlockSpec(memory_space=pltpu.MemorySpace.VMEM)

    score, path = pl.pallas_call(
        functools.partial(_bilstm_crf_kernel,
                          start_idx=start_idx, stop_idx=stop_idx),
        out_shape=(jax.ShapeDtypeStruct((1, 1), jnp.float32),
                   jax.ShapeDtypeStruct((1, S), jnp.int32)),
        in_specs=[vmem, vmem, vmem],
        out_specs=(vmem, vmem),
    )(embeds, slab_a, slab_b)

    return score[0, 0], path[0]


def init_params(key, vocab_size, embedding_dim, hidden_dim, tagset_size,
                start_idx, stop_idx):
    E, H, T = embedding_dim, hidden_dim // 2, tagset_size
    ks = jax.random.split(key, 16)
    n = lambda k, s, scale=0.1: scale * jax.random.normal(k, s, jnp.float32)
    p = {
        "embedding": n(ks[0], (vocab_size, E), 1.0),
        # gate-stacked LSTM weights, lane order [i | f | g | o] per direction
        "wih_f": n(ks[1], (E, 4 * H)), "whh_f": n(ks[2], (H, 4 * H)),
        "b_f":   n(ks[3], (1, 4 * H)),
        "wih_b": n(ks[4], (E, 4 * H)), "whh_b": n(ks[5], (H, 4 * H)),
        "b_b":   n(ks[6], (1, 4 * H)),
        # init_hidden(): randn(2,1,H) for h and c -> split per direction
        "h0_f": n(ks[7], (1, H), 1.0), "c0_f": n(ks[8], (1, H), 1.0),
        "h0_b": n(ks[9], (1, H), 1.0), "c0_b": n(ks[10], (1, H), 1.0),
        # hidden2tag Linear(2H, T), W.T split into fwd/bwd halves
        "wout_f": n(ks[11], (H, T)), "wout_b": n(ks[12], (H, T)),
        "bout":   n(ks[13], (1, T)),
    }
    trans = jax.random.normal(ks[14], (T, T), jnp.float32)
    trans = trans.at[start_idx, :].set(-10000.0)   # never transition TO START
    trans = trans.at[:, stop_idx].set(-10000.0)    # never transition FROM STOP
    p["transitions"] = trans
    return p


if __name__ == "__main__":
    tag_to_ix = {"B": 0, "I": 1, "O": 2, START_TAG: 3, STOP_TAG: 4}
    vocab_size, embedding_dim, hidden_dim = 20, 16, 32
    seq_len = 8
    start_idx, stop_idx = tag_to_ix[START_TAG], tag_to_ix[STOP_TAG]

    key = jax.random.PRNGKey(0)
    k_param, k_sent = jax.random.split(key)
    params = init_params(k_param, vocab_size, embedding_dim, hidden_dim,
                         len(tag_to_ix), start_idx, stop_idx)
    sentence = jax.random.randint(k_sent, (seq_len,), 0, vocab_size, jnp.int32)

    score, tag_seq = bilstm_crf_forward(sentence, params,
                                        start_idx=start_idx, stop_idx=stop_idx)
    jax.block_until_ready((score, tag_seq))

    assert tag_seq.shape == (seq_len,)
    assert bool(jnp.all((tag_seq >= 0) & (tag_seq < len(tag_to_ix))))
    print("KERNEL_OK")
</pallas_src>

<mosaic_0001>
module attributes {stable_mosaic.version = 11 : i64} {
  func.func @_bilstm_crf_kernel(%arg0: memref<8x16xf32, #tpu.memory_space<vmem>>, %arg1: memref<51x128xf32, #tpu.memory_space<vmem>>, %arg2: memref<43x5xf32, #tpu.memory_space<vmem>>, %arg3: memref<1x1xf32, #tpu.memory_space<vmem>>, %arg4: memref<1x8xi32, #tpu.memory_space<vmem>>) attributes {dimension_semantics = [], scalar_prefetch = 0 : i64, scratch_operands = 0 : i64, tpu.core_type = #tpu.core_type<tc>} {
    %c0 = arith.constant 0 : index
    %c0_0 = arith.constant 0 : index
    %0 = vector.load %arg1[%c0, %c0_0] : memref<51x128xf32, #tpu.memory_space<vmem>>, vector<16x128xf32>
    %c16 = arith.constant 16 : index
    %c0_1 = arith.constant 0 : index
    %1 = vector.load %arg1[%c16, %c0_1] : memref<51x128xf32, #tpu.memory_space<vmem>>, vector<32x128xf32>
    %c48 = arith.constant 48 : index
    %c0_2 = arith.constant 0 : index
    %2 = vector.load %arg1[%c48, %c0_2] : memref<51x128xf32, #tpu.memory_space<vmem>>, vector<1x128xf32>
    %c49 = arith.constant 49 : index
    %c0_3 = arith.constant 0 : index
    %3 = vector.load %arg1[%c49, %c0_3] : memref<51x128xf32, #tpu.memory_space<vmem>>, vector<1x128xf32>
    %4 = vector.extract_strided_slice %3 {offsets = [0, 0], sizes = [1, 32], strides = [1, 1]} : vector<1x128xf32> to vector<1x32xf32>
    %c50 = arith.constant 50 : index
    %c0_4 = arith.constant 0 : index
    %5 = vector.load %arg1[%c50, %c0_4] : memref<51x128xf32, #tpu.memory_space<vmem>>, vector<1x128xf32>
    %6 = vector.extract_strided_slice %5 {offsets = [0, 0], sizes = [1, 32], strides = [1, 1]} : vector<1x128xf32> to vector<1x32xf32>
    %c0_5 = arith.constant 0 : index
    %c0_6 = arith.constant 0 : index
    %7 = vector.load %arg2[%c0_5, %c0_6] : memref<43x5xf32, #tpu.memory_space<vmem>>, vector<32x5xf32>
    %c32 = arith.constant 32 : index
    %c0_7 = arith.constant 0 : index
    %8 = vector.load %arg2[%c32, %c0_7] : memref<43x5xf32, #tpu.memory_space<vmem>>, vector<1x5xf32>
    %c33 = arith.constant 33 : index
    %c0_8 = arith.constant 0 : index
    %9 = vector.load %arg2[%c33, %c0_8] : memref<43x5xf32, #tpu.memory_space<vmem>>, vector<5x5xf32>
    %c38 = arith.constant 38 : index
    %c0_9 = arith.constant 0 : index
    %10 = vector.load %arg2[%c38, %c0_9] : memref<43x5xf32, #tpu.memory_space<vmem>>, vector<5x5xf32>
    %c0_10 = arith.constant 0 : index
    %c0_11 = arith.constant 0 : index
    %11 = vector.load %arg0[%c0_10, %c0_11] : memref<8x16xf32, #tpu.memory_space<vmem>>, vector<8x16xf32>
    %cst = arith.constant dense<0.000000e+00> : vector<8x128xf32>
    %12 = tpu.matmul %11, %0, %cst {dimension_numbers = #tpu.dot_dimension_numbers<[1], [0], [0], [1], [0, 0, 1, 1], [], []>} : vector<8x16xf32>, vector<16x128xf32>, vector<8x128xf32> -> vector<8x128xf32>
    %13 = vector.broadcast %2 : vector<1x128xf32> to vector<8x128xf32>
    %14 = arith.addf %12, %13 : vector<8x128xf32>
    %15 = tpu.iota {dimensions = array<i32: 1>} : vector<1x128xi32>
    %c16_i32 = arith.constant 16 : i32
    %16 = vector.broadcast %c16_i32 : i32 to vector<1x128xi32>
    %17 = arith.cmpi slt, %15, %16 : vector<1x128xi32>
    %c32_i32 = arith.constant 32 : i32
    %18 = vector.broadcast %c32_i32 : i32 to vector<1x128xi32>
    %19 = arith.cmpi sge, %15, %18 : vector<1x128xi32>
    %c48_i32 = arith.constant 48 : i32
    %20 = vector.broadcast %c48_i32 : i32 to vector<1x128xi32>
    %21 = arith.cmpi slt, %15, %20 : vector<1x128xi32>
    %22 = arith.andi %19, %21 : vector<1x128xi1>
    %23 = arith.ori %17, %22 : vector<1x128xi1>
    %c64_i32 = arith.constant 64 : i32
    %24 = vector.broadcast %c64_i32 : i32 to vector<1x128xi32>
    %25 = arith.cmpi sge, %15, %24 : vector<1x128xi32>
    %c80_i32 = arith.constant 80 : i32
    %26 = vector.broadcast %c80_i32 : i32 to vector<1x128xi32>
    %27 = arith.cmpi slt, %15, %26 : vector<1x128xi32>
    %28 = arith.andi %25, %27 : vector<1x128xi1>
    %29 = arith.ori %23, %28 : vector<1x128xi1>
    %c96_i32 = arith.constant 96 : i32
    %30 = vector.broadcast %c96_i32 : i32 to vector<1x128xi32>
    %31 = arith.cmpi sge, %15, %30 : vector<1x128xi32>
    %c112_i32 = arith.constant 112 : i32
    %32 = vector.broadcast %c112_i32 : i32 to vector<1x128xi32>
    %33 = arith.cmpi slt, %15, %32 : vector<1x128xi32>
    %34 = arith.andi %31, %33 : vector<1x128xi1>
    %35 = arith.ori %29, %34 : vector<1x128xi1>
    %36 = tpu.iota {dimensions = array<i32: 0>} : vector<8x32xi32>
    %37 = tpu.iota {dimensions = array<i32: 1>} : vector<8x32xi32>
    %c16_i32_12 = arith.constant 16 : i32
    %38 = vector.broadcast %c16_i32_12 : i32 to vector<8x32xi32>
    %39 = arith.cmpi slt, %37, %38 : vector<8x32xi32>
    %cst_13 = arith.constant 0.000000e+00 : f32
    %40 = vector.broadcast %cst_13 : f32 to vector<8x32xf32>
    %41 = vector.extract_strided_slice %14 {offsets = [0, 0], sizes = [1, 128], strides = [1, 1]} : vector<8x128xf32> to vector<1x128xf32>
    %42 = vector.extract_strided_slice %14 {offsets = [7, 0], sizes = [1, 128], strides = [1, 1]} : vector<8x128xf32> to vector<1x128xf32>
    %43 = arith.select %35, %41, %42 : vector<1x128xi1>, vector<1x128xf32>
    %cst_14 = arith.constant dense<0.000000e+00> : vector<1x128xf32>
    %44 = tpu.matmul %4, %1, %cst_14 {dimension_numbers = #tpu.dot_dimension_numbers<[1], [0], [0], [1], [0, 0, 1, 1], [], []>} : vector<1x32xf32>, vector<32x128xf32>, vector<1x128xf32> -> vector<1x128xf32>
    %45 = arith.addf %43, %44 : vector<1x128xf32>
    %46 = vector.extract_strided_slice %45 {offsets = [0, 0], sizes = [1, 96], strides = [1, 1]} : vector<1x128xf32> to vector<1x96xf32>
    %47 = arith.negf %46 : vector<1x96xf32>
    %48 = math.exp %47 : vector<1x96xf32>
    %cst_15 = arith.constant 1.000000e+00 : f32
    %49 = vector.broadcast %cst_15 : f32 to vector<1x96xf32>
    %50 = arith.addf %49, %48 : vector<1x96xf32>
    %51 = arith.divf %49, %50 : vector<1x96xf32>
    %52 = vector.extract_strided_slice %51 {offsets = [0, 0], sizes = [1, 32], strides = [1, 1]} : vector<1x96xf32> to vector<1x32xf32>
    %53 = vector.extract_strided_slice %51 {offsets = [0, 32], sizes = [1, 32], strides = [1, 1]} : vector<1x96xf32> to vector<1x32xf32>
    %54 = vector.extract_strided_slice %51 {offsets = [0, 64], sizes = [1, 32], strides = [1, 1]} : vector<1x96xf32> to vector<1x32xf32>
    %55 = vector.extract_strided_slice %45 {offsets = [0, 96], sizes = [1, 32], strides = [1, 1]} : vector<1x128xf32> to vector<1x32xf32>
    %56 = math.tanh %55 : vector<1x32xf32>
    %57 = arith.mulf %53, %6 : vector<1x32xf32>
    %58 = arith.mulf %52, %56 : vector<1x32xf32>
    %59 = arith.addf %57, %58 : vector<1x32xf32>
    %60 = math.tanh %59 : vector<1x32xf32>
    %61 = arith.mulf %54, %60 : vector<1x32xf32>
    %c0_i32 = arith.constant 0 : i32
    %62 = vector.broadcast %c0_i32 : i32 to vector<8x32xi32>
    %63 = arith.cmpi eq, %36, %62 : vector<8x32xi32>
    %64 = arith.andi %39, %63 : vector<8x32xi1>
    %cst_16 = arith.constant dense<true> : vector<8x32xi1>
    %65 = arith.xori %39, %cst_16 : vector<8x32xi1>
    %c7_i32 = arith.constant 7 : i32
    %66 = vector.broadcast %c7_i32 : i32 to vector<8x32xi32>
    %67 = arith.cmpi eq, %36, %66 : vector<8x32xi32>
    %68 = arith.andi %65, %67 : vector<8x32xi1>
    %69 = arith.ori %64, %68 : vector<8x32xi1>
    %70 = vector.shape_cast %61 : vector<1x32xf32> to vector<1x32xf32>
    %71 = vector.broadcast %70 : vector<1x32xf32> to vector<8x32xf32>
    %72 = arith.select %69, %71, %40 : vector<8x32xi1>, vector<8x32xf32>
    %73 = vector.extract_strided_slice %14 {offsets = [1, 0], sizes = [1, 128], strides = [1, 1]} : vector<8x128xf32> to vector<1x128xf32>
    %74 = vector.extract_strided_slice %14 {offsets = [6, 0], sizes = [1, 128], strides = [1, 1]} : vector<8x128xf32> to vector<1x128xf32>
    %75 = arith.select %35, %73, %74 : vector<1x128xi1>, vector<1x128xf32>
    %cst_17 = arith.constant dense<0.000000e+00> : vector<1x128xf32>
    %76 = tpu.matmul %61, %1, %cst_17 {dimension_numbers = #tpu.dot_dimension_numbers<[1], [0], [0], [1], [0, 0, 1, 1], [], []>} : vector<1x32xf32>, vector<32x128xf32>, vector<1x128xf32> -> vector<1x128xf32>
    %77 = arith.addf %75, %76 : vector<1x128xf32>
    %78 = vector.extract_strided_slice %77 {offsets = [0, 0], sizes = [1, 96], strides = [1, 1]} : vector<1x128xf32> to vector<1x96xf32>
    %79 = arith.negf %78 : vector<1x96xf32>
    %80 = math.exp %79 : vector<1x96xf32>
    %cst_18 = arith.constant 1.000000e+00 : f32
    %81 = vector.broadcast %cst_18 : f32 to vector<1x96xf32>
    %82 = arith.addf %81, %80 : vector<1x96xf32>
    %83 = arith.divf %81, %82 : vector<1x96xf32>
    %84 = vector.extract_strided_slice %83 {offsets = [0, 0], sizes = [1, 32], strides = [1, 1]} : vector<1x96xf32> to vector<1x32xf32>
    %85 = vector.extract_strided_slice %83 {offsets = [0, 32], sizes = [1, 32], strides = [1, 1]} : vector<1x96xf32> to vector<1x32xf32>
    %86 = vector.extract_strided_slice %83 {offsets = [0, 64], sizes = [1, 32], strides = [1, 1]} : vector<1x96xf32> to vector<1x32xf32>
    %87 = vector.extract_strided_slice %77 {offsets = [0, 96], sizes = [1, 32], strides = [1, 1]} : vector<1x128xf32> to vector<1x32xf32>
    %88 = math.tanh %87 : vector<1x32xf32>
    %89 = arith.mulf %85, %59 : vector<1x32xf32>
    %90 = arith.mulf %84, %88 : vector<1x32xf32>
    %91 = arith.addf %89, %90 : vector<1x32xf32>
    %92 = math.tanh %91 : vector<1x32xf32>
    %93 = arith.mulf %86, %92 : vector<1x32xf32>
    %c1_i32 = arith.constant 1 : i32
    %94 = vector.broadcast %c1_i32 : i32 to vector<8x32xi32>
    %95 = arith.cmpi eq, %36, %94 : vector<8x32xi32>
    %96 = arith.andi %39, %95 : vector<8x32xi1>
    %cst_19 = arith.constant dense<true> : vector<8x32xi1>
    %97 = arith.xori %39, %cst_19 : vector<8x32xi1>
    %c6_i32 = arith.constant 6 : i32
    %98 = vector.broadcast %c6_i32 : i32 to vector<8x32xi32>
    %99 = arith.cmpi eq, %36, %98 : vector<8x32xi32>
    %100 = arith.andi %97, %99 : vector<8x32xi1>
    %101 = arith.ori %96, %100 : vector<8x32xi1>
    %102 = vector.shape_cast %93 : vector<1x32xf32> to vector<1x32xf32>
    %103 = vector.broadcast %102 : vector<1x32xf32> to vector<8x32xf32>
    %104 = arith.select %101, %103, %72 : vector<8x32xi1>, vector<8x32xf32>
    %105 = vector.extract_strided_slice %14 {offsets = [2, 0], sizes = [1, 128], strides = [1, 1]} : vector<8x128xf32> to vector<1x128xf32>
    %106 = vector.extract_strided_slice %14 {offsets = [5, 0], sizes = [1, 128], strides = [1, 1]} : vector<8x128xf32> to vector<1x128xf32>
    %107 = arith.select %35, %105, %106 : vector<1x128xi1>, vector<1x128xf32>
    %cst_20 = arith.constant dense<0.000000e+00> : vector<1x128xf32>
    %108 = tpu.matmul %93, %1, %cst_20 {dimension_numbers = #tpu.dot_dimension_numbers<[1], [0], [0], [1], [0, 0, 1, 1], [], []>} : vector<1x32xf32>, vector<32x128xf32>, vector<1x128xf32> -> vector<1x128xf32>
    %109 = arith.addf %107, %108 : vector<1x128xf32>
    %110 = vector.extract_strided_slice %109 {offsets = [0, 0], sizes = [1, 96], strides = [1, 1]} : vector<1x128xf32> to vector<1x96xf32>
    %111 = arith.negf %110 : vector<1x96xf32>
    %112 = math.exp %111 : vector<1x96xf32>
    %cst_21 = arith.constant 1.000000e+00 : f32
    %113 = vector.broadcast %cst_21 : f32 to vector<1x96xf32>
    %114 = arith.addf %113, %112 : vector<1x96xf32>
    %115 = arith.divf %113, %114 : vector<1x96xf32>
    %116 = vector.extract_strided_slice %115 {offsets = [0, 0], sizes = [1, 32], strides = [1, 1]} : vector<1x96xf32> to vector<1x32xf32>
    %117 = vector.extract_strided_slice %115 {offsets = [0, 32], sizes = [1, 32], strides = [1, 1]} : vector<1x96xf32> to vector<1x32xf32>
    %118 = vector.extract_strided_slice %115 {offsets = [0, 64], sizes = [1, 32], strides = [1, 1]} : vector<1x96xf32> to vector<1x32xf32>
    %119 = vector.extract_strided_slice %109 {offsets = [0, 96], sizes = [1, 32], strides = [1, 1]} : vector<1x128xf32> to vector<1x32xf32>
    %120 = math.tanh %119 : vector<1x32xf32>
    %121 = arith.mulf %117, %91 : vector<1x32xf32>
    %122 = arith.mulf %116, %120 : vector<1x32xf32>
    %123 = arith.addf %121, %122 : vector<1x32xf32>
    %124 = math.tanh %123 : vector<1x32xf32>
    %125 = arith.mulf %118, %124 : vector<1x32xf32>
    %c2_i32 = arith.constant 2 : i32
    %126 = vector.broadcast %c2_i32 : i32 to vector<8x32xi32>
    %127 = arith.cmpi eq, %36, %126 : vector<8x32xi32>
    %128 = arith.andi %39, %127 : vector<8x32xi1>
    %cst_22 = arith.constant dense<true> : vector<8x32xi1>
    %129 = arith.xori %39, %cst_22 : vector<8x32xi1>
    %c5_i32 = arith.constant 5 : i32
    %130 = vector.broadcast %c5_i32 : i32 to vector<8x32xi32>
    %131 = arith.cmpi eq, %36, %130 : vector<8x32xi32>
    %132 = arith.andi %129, %131 : vector<8x32xi1>
    %133 = arith.ori %128, %132 : vector<8x32xi1>
    %134 = vector.shape_cast %125 : vector<1x32xf32> to vector<1x32xf32>
    %135 = vector.broadcast %134 : vector<1x32xf32> to vector<8x32xf32>
    %136 = arith.select %133, %135, %104 : vector<8x32xi1>, vector<8x32xf32>
    %137 = vector.extract_strided_slice %14 {offsets = [3, 0], sizes = [1, 128], strides = [1, 1]} : vector<8x128xf32> to vector<1x128xf32>
    %138 = vector.extract_strided_slice %14 {offsets = [4, 0], sizes = [1, 128], strides = [1, 1]} : vector<8x128xf32> to vector<1x128xf32>
    %139 = arith.select %35, %137, %138 : vector<1x128xi1>, vector<1x128xf32>
    %cst_23 = arith.constant dense<0.000000e+00> : vector<1x128xf32>
    %140 = tpu.matmul %125, %1, %cst_23 {dimension_numbers = #tpu.dot_dimension_numbers<[1], [0], [0], [1], [0, 0, 1, 1], [], []>} : vector<1x32xf32>, vector<32x128xf32>, vector<1x128xf32> -> vector<1x128xf32>
    %141 = arith.addf %139, %140 : vector<1x128xf32>
    %142 = vector.extract_strided_slice %141 {offsets = [0, 0], sizes = [1, 96], strides = [1, 1]} : vector<1x128xf32> to vector<1x96xf32>
    %143 = arith.negf %142 : vector<1x96xf32>
    %144 = math.exp %143 : vector<1x96xf32>
    %cst_24 = arith.constant 1.000000e+00 : f32
    %145 = vector.broadcast %cst_24 : f32 to vector<1x96xf32>
    %146 = arith.addf %145, %144 : vector<1x96xf32>
    %147 = arith.divf %145, %146 : vector<1x96xf32>
    %148 = vector.extract_strided_slice %147 {offsets = [0, 0], sizes = [1, 32], strides = [1, 1]} : vector<1x96xf32> to vector<1x32xf32>
    %149 = vector.extract_strided_slice %147 {offsets = [0, 32], sizes = [1, 32], strides = [1, 1]} : vector<1x96xf32> to vector<1x32xf32>
    %150 = vector.extract_strided_slice %147 {offsets = [0, 64], sizes = [1, 32], strides = [1, 1]} : vector<1x96xf32> to vector<1x32xf32>
    %151 = vector.extract_strided_slice %141 {offsets = [0, 96], sizes = [1, 32], strides = [1, 1]} : vector<1x128xf32> to vector<1x32xf32>
    %152 = math.tanh %151 : vector<1x32xf32>
    %153 = arith.mulf %149, %123 : vector<1x32xf32>
    %154 = arith.mulf %148, %152 : vector<1x32xf32>
    %155 = arith.addf %153, %154 : vector<1x32xf32>
    %156 = math.tanh %155 : vector<1x32xf32>
    %157 = arith.mulf %150, %156 : vector<1x32xf32>
    %c3_i32 = arith.constant 3 : i32
    %158 = vector.broadcast %c3_i32 : i32 to vector<8x32xi32>
    %159 = arith.cmpi eq, %36, %158 : vector<8x32xi32>
    %160 = arith.andi %39, %159 : vector<8x32xi1>
    %cst_25 = arith.constant dense<true> : vector<8x32xi1>
    %161 = arith.xori %39, %cst_25 : vector<8x32xi1>
    %c4_i32 = arith.constant 4 : i32
    %162 = vector.broadcast %c4_i32 : i32 to vector<8x32xi32>
    %163 = arith.cmpi eq, %36, %162 : vector<8x32xi32>
    %164 = arith.andi %161, %163 : vector<8x32xi1>
    %165 = arith.ori %160, %164 : vector<8x32xi1>
    %166 = vector.shape_cast %157 : vector<1x32xf32> to vector<1x32xf32>
    %167 = vector.broadcast %166 : vector<1x32xf32> to vector<8x32xf32>
    %168 = arith.select %165, %167, %136 : vector<8x32xi1>, vector<8x32xf32>
    %169 = vector.extract_strided_slice %14 {offsets = [4, 0], sizes = [1, 128], strides = [1, 1]} : vector<8x128xf32> to vector<1x128xf32>
    %170 = vector.extract_strided_slice %14 {offsets = [3, 0], sizes = [1, 128], strides = [1, 1]} : vector<8x128xf32> to vector<1x128xf32>
    %171 = arith.select %35, %169, %170 : vector<1x128xi1>, vector<1x128xf32>
    %cst_26 = arith.constant dense<0.000000e+00> : vector<1x128xf32>
    %172 = tpu.matmul %157, %1, %cst_26 {dimension_numbers = #tpu.dot_dimension_numbers<[1], [0], [0], [1], [0, 0, 1, 1], [], []>} : vector<1x32xf32>, vector<32x128xf32>, vector<1x128xf32> -> vector<1x128xf32>
    %173 = arith.addf %171, %172 : vector<1x128xf32>
    %174 = vector.extract_strided_slice %173 {offsets = [0, 0], sizes = [1, 96], strides = [1, 1]} : vector<1x128xf32> to vector<1x96xf32>
    %175 = arith.negf %174 : vector<1x96xf32>
    %176 = math.exp %175 : vector<1x96xf32>
    %cst_27 = arith.constant 1.000000e+00 : f32
    %177 = vector.broadcast %cst_27 : f32 to vector<1x96xf32>
    %178 = arith.addf %177, %176 : vector<1x96xf32>
    %179 = arith.divf %177, %178 : vector<1x96xf32>
    %180 = vector.extract_strided_slice %179 {offsets = [0, 0], sizes = [1, 32], strides = [1, 1]} : vector<1x96xf32> to vector<1x32xf32>
    %181 = vector.extract_strided_slice %179 {offsets = [0, 32], sizes = [1, 32], strides = [1, 1]} : vector<1x96xf32> to vector<1x32xf32>
    %182 = vector.extract_strided_slice %179 {offsets = [0, 64], sizes = [1, 32], strides = [1, 1]} : vector<1x96xf32> to vector<1x32xf32>
    %183 = vector.extract_strided_slice %173 {offsets = [0, 96], sizes = [1, 32], strides = [1, 1]} : vector<1x128xf32> to vector<1x32xf32>
    %184 = math.tanh %183 : vector<1x32xf32>
    %185 = arith.mulf %181, %155 : vector<1x32xf32>
    %186 = arith.mulf %180, %184 : vector<1x32xf32>
    %187 = arith.addf %185, %186 : vector<1x32xf32>
    %188 = math.tanh %187 : vector<1x32xf32>
    %189 = arith.mulf %182, %188 : vector<1x32xf32>
    %c4_i32_28 = arith.constant 4 : i32
    %190 = vector.broadcast %c4_i32_28 : i32 to vector<8x32xi32>
    %191 = arith.cmpi eq, %36, %190 : vector<8x32xi32>
    %192 = arith.andi %39, %191 : vector<8x32xi1>
    %cst_29 = arith.constant dense<true> : vector<8x32xi1>
    %193 = arith.xori %39, %cst_29 : vector<8x32xi1>
    %c3_i32_30 = arith.constant 3 : i32
    %194 = vector.broadcast %c3_i32_30 : i32 to vector<8x32xi32>
    %195 = arith.cmpi eq, %36, %194 : vector<8x32xi32>
    %196 = arith.andi %193, %195 : vector<8x32xi1>
    %197 = arith.ori %192, %196 : vector<8x32xi1>
    %198 = vector.shape_cast %189 : vector<1x32xf32> to vector<1x32xf32>
    %199 = vector.broadcast %198 : vector<1x32xf32> to vector<8x32xf32>
    %200 = arith.select %197, %199, %168 : vector<8x32xi1>, vector<8x32xf32>
    %201 = vector.extract_strided_slice %14 {offsets = [5, 0], sizes = [1, 128], strides = [1, 1]} : vector<8x128xf32> to vector<1x128xf32>
    %202 = vector.extract_strided_slice %14 {offsets = [2, 0], sizes = [1, 128], strides = [1, 1]} : vector<8x128xf32> to vector<1x128xf32>
    %203 = arith.select %35, %201, %202 : vector<1x128xi1>, vector<1x128xf32>
    %cst_31 = arith.constant dense<0.000000e+00> : vector<1x128xf32>
    %204 = tpu.matmul %189, %1, %cst_31 {dimension_numbers = #tpu.dot_dimension_numbers<[1], [0], [0], [1], [0, 0, 1, 1], [], []>} : vector<1x32xf32>, vector<32x128xf32>, vector<1x128xf32> -> vector<1x128xf32>
    %205 = arith.addf %203, %204 : vector<1x128xf32>
    %206 = vector.extract_strided_slice %205 {offsets = [0, 0], sizes = [1, 96], strides = [1, 1]} : vector<1x128xf32> to vector<1x96xf32>
    %207 = arith.negf %206 : vector<1x96xf32>
    %208 = math.exp %207 : vector<1x96xf32>
    %cst_32 = arith.constant 1.000000e+00 : f32
    %209 = vector.broadcast %cst_32 : f32 to vector<1x96xf32>
    %210 = arith.addf %209, %208 : vector<1x96xf32>
    %211 = arith.divf %209, %210 : vector<1x96xf32>
    %212 = vector.extract_strided_slice %211 {offsets = [0, 0], sizes = [1, 32], strides = [1, 1]} : vector<1x96xf32> to vector<1x32xf32>
    %213 = vector.extract_strided_slice %211 {offsets = [0, 32], sizes = [1, 32], strides = [1, 1]} : vector<1x96xf32> to vector<1x32xf32>
    %214 = vector.extract_strided_slice %211 {offsets = [0, 64], sizes = [1, 32], strides = [1, 1]} : vector<1x96xf32> to vector<1x32xf32>
    %215 = vector.extract_strided_slice %205 {offsets = [0, 96], sizes = [1, 32], strides = [1, 1]} : vector<1x128xf32> to vector<1x32xf32>
    %216 = math.tanh %215 : vector<1x32xf32>
    %217 = arith.mulf %213, %187 : vector<1x32xf32>
    %218 = arith.mulf %212, %216 : vector<1x32xf32>
    %219 = arith.addf %217, %218 : vector<1x32xf32>
    %220 = math.tanh %219 : vector<1x32xf32>
    %221 = arith.mulf %214, %220 : vector<1x32xf32>
    %c5_i32_33 = arith.constant 5 : i32
    %222 = vector.broadcast %c5_i32_33 : i32 to vector<8x32xi32>
    %223 = arith.cmpi eq, %36, %222 : vector<8x32xi32>
    %224 = arith.andi %39, %223 : vector<8x32xi1>
    %cst_34 = arith.constant dense<true> : vector<8x32xi1>
    %225 = arith.xori %39, %cst_34 : vector<8x32xi1>
    %c2_i32_35 = arith.constant 2 : i32
    %226 = vector.broadcast %c2_i32_35 : i32 to vector<8x32xi32>
    %227 = arith.cmpi eq, %36, %226 : vector<8x32xi32>
    %228 = arith.andi %225, %227 : vector<8x32xi1>
    %229 = arith.ori %224, %228 : vector<8x32xi1>
    %230 = vector.shape_cast %221 : vector<1x32xf32> to vector<1x32xf32>
    %231 = vector.broadcast %230 : vector<1x32xf32> to vector<8x32xf32>
    %232 = arith.select %229, %231, %200 : vector<8x32xi1>, vector<8x32xf32>
    %233 = vector.extract_strided_slice %14 {offsets = [6, 0], sizes = [1, 128], strides = [1, 1]} : vector<8x128xf32> to vector<1x128xf32>
    %234 = vector.extract_strided_slice %14 {offsets = [1, 0], sizes = [1, 128], strides = [1, 1]} : vector<8x128xf32> to vector<1x128xf32>
    %235 = arith.select %35, %233, %234 : vector<1x128xi1>, vector<1x128xf32>
    %cst_36 = arith.constant dense<0.000000e+00> : vector<1x128xf32>
    %236 = tpu.matmul %221, %1, %cst_36 {dimension_numbers = #tpu.dot_dimension_numbers<[1], [0], [0], [1], [0, 0, 1, 1], [], []>} : vector<1x32xf32>, vector<32x128xf32>, vector<1x128xf32> -> vector<1x128xf32>
    %237 = arith.addf %235, %236 : vector<1x128xf32>
    %238 = vector.extract_strided_slice %237 {offsets = [0, 0], sizes = [1, 96], strides = [1, 1]} : vector<1x128xf32> to vector<1x96xf32>
    %239 = arith.negf %238 : vector<1x96xf32>
    %240 = math.exp %239 : vector<1x96xf32>
    %cst_37 = arith.constant 1.000000e+00 : f32
    %241 = vector.broadcast %cst_37 : f32 to vector<1x96xf32>
    %242 = arith.addf %241, %240 : vector<1x96xf32>
    %243 = arith.divf %241, %242 : vector<1x96xf32>
    %244 = vector.extract_strided_slice %243 {offsets = [0, 0], sizes = [1, 32], strides = [1, 1]} : vector<1x96xf32> to vector<1x32xf32>
    %245 = vector.extract_strided_slice %243 {offsets = [0, 32], sizes = [1, 32], strides = [1, 1]} : vector<1x96xf32> to vector<1x32xf32>
    %246 = vector.extract_strided_slice %243 {offsets = [0, 64], sizes = [1, 32], strides = [1, 1]} : vector<1x96xf32> to vector<1x32xf32>
    %247 = vector.extract_strided_slice %237 {offsets = [0, 96], sizes = [1, 32], strides = [1, 1]} : vector<1x128xf32> to vector<1x32xf32>
    %248 = math.tanh %247 : vector<1x32xf32>
    %249 = arith.mulf %245, %219 : vector<1x32xf32>
    %250 = arith.mulf %244, %248 : vector<1x32xf32>
    %251 = arith.addf %249, %250 : vector<1x32xf32>
    %252 = math.tanh %251 : vector<1x32xf32>
    %253 = arith.mulf %246, %252 : vector<1x32xf32>
    %c6_i32_38 = arith.constant 6 : i32
    %254 = vector.broadcast %c6_i32_38 : i32 to vector<8x32xi32>
    %255 = arith.cmpi eq, %36, %254 : vector<8x32xi32>
    %256 = arith.andi %39, %255 : vector<8x32xi1>
    %cst_39 = arith.constant dense<true> : vector<8x32xi1>
    %257 = arith.xori %39, %cst_39 : vector<8x32xi1>
    %c1_i32_40 = arith.constant 1 : i32
    %258 = vector.broadcast %c1_i32_40 : i32 to vector<8x32xi32>
    %259 = arith.cmpi eq, %36, %258 : vector<8x32xi32>
    %260 = arith.andi %257, %259 : vector<8x32xi1>
    %261 = arith.ori %256, %260 : vector<8x32xi1>
    %262 = vector.shape_cast %253 : vector<1x32xf32> to vector<1x32xf32>
    %263 = vector.broadcast %262 : vector<1x32xf32> to vector<8x32xf32>
    %264 = arith.select %261, %263, %232 : vector<8x32xi1>, vector<8x32xf32>
    %265 = vector.extract_strided_slice %14 {offsets = [7, 0], sizes = [1, 128], strides = [1, 1]} : vector<8x128xf32> to vector<1x128xf32>
    %266 = vector.extract_strided_slice %14 {offsets = [0, 0], sizes = [1, 128], strides = [1, 1]} : vector<8x128xf32> to vector<1x128xf32>
    %267 = arith.select %35, %265, %266 : vector<1x128xi1>, vector<1x128xf32>
    %cst_41 = arith.constant dense<0.000000e+00> : vector<1x128xf32>
    %268 = tpu.matmul %253, %1, %cst_41 {dimension_numbers = #tpu.dot_dimension_numbers<[1], [0], [0], [1], [0, 0, 1, 1], [], []>} : vector<1x32xf32>, vector<32x128xf32>, vector<1x128xf32> -> vector<1x128xf32>
    %269 = arith.addf %267, %268 : vector<1x128xf32>
    %270 = vector.extract_strided_slice %269 {offsets = [0, 0], sizes = [1, 96], strides = [1, 1]} : vector<1x128xf32> to vector<1x96xf32>
    %271 = arith.negf %270 : vector<1x96xf32>
    %272 = math.exp %271 : vector<1x96xf32>
    %cst_42 = arith.constant 1.000000e+00 : f32
    %273 = vector.broadcast %cst_42 : f32 to vector<1x96xf32>
    %274 = arith.addf %273, %272 : vector<1x96xf32>
    %275 = arith.divf %273, %274 : vector<1x96xf32>
    %276 = vector.extract_strided_slice %275 {offsets = [0, 0], sizes = [1, 32], strides = [1, 1]} : vector<1x96xf32> to vector<1x32xf32>
    %277 = vector.extract_strided_slice %275 {offsets = [0, 32], sizes = [1, 32], strides = [1, 1]} : vector<1x96xf32> to vector<1x32xf32>
    %278 = vector.extract_strided_slice %275 {offsets = [0, 64], sizes = [1, 32], strides = [1, 1]} : vector<1x96xf32> to vector<1x32xf32>
    %279 = vector.extract_strided_slice %269 {offsets = [0, 96], sizes = [1, 32], strides = [1, 1]} : vector<1x128xf32> to vector<1x32xf32>
    %280 = math.tanh %279 : vector<1x32xf32>
    %281 = arith.mulf %277, %251 : vector<1x32xf32>
    %282 = arith.mulf %276, %280 : vector<1x32xf32>
    %283 = arith.addf %281, %282 : vector<1x32xf32>
    %284 = math.tanh %283 : vector<1x32xf32>
    %285 = arith.mulf %278, %284 : vector<1x32xf32>
    %c7_i32_43 = arith.constant 7 : i32
    %286 = vector.broadcast %c7_i32_43 : i32 to vector<8x32xi32>
    %287 = arith.cmpi eq, %36, %286 : vector<8x32xi32>
    %288 = arith.andi %39, %287 : vector<8x32xi1>
    %cst_44 = arith.constant dense<true> : vector<8x32xi1>
    %289 = arith.xori %39, %cst_44 : vector<8x32xi1>
    %c0_i32_45 = arith.constant 0 : i32
    %290 = vector.broadcast %c0_i32_45 : i32 to vector<8x32xi32>
    %291 = arith.cmpi eq, %36, %290 : vector<8x32xi32>
    %292 = arith.andi %289, %291 : vector<8x32xi1>
    %293 = arith.ori %288, %292 : vector<8x32xi1>
    %294 = vector.shape_cast %285 : vector<1x32xf32> to vector<1x32xf32>
    %295 = vector.broadcast %294 : vector<1x32xf32> to vector<8x32xf32>
    %296 = arith.select %293, %295, %264 : vector<8x32xi1>, vector<8x32xf32>
    %cst_46 = arith.constant dense<0.000000e+00> : vector<8x5xf32>
    %297 = tpu.matmul %296, %7, %cst_46 {dimension_numbers = #tpu.dot_dimension_numbers<[1], [0], [0], [1], [0, 0, 1, 1], [], []>} : vector<8x32xf32>, vector<32x5xf32>, vector<8x5xf32> -> vector<8x5xf32>
    %298 = vector.broadcast %8 : vector<1x5xf32> to vector<8x5xf32>
    %299 = arith.addf %297, %298 : vector<8x5xf32>
    %300 = tpu.iota {dimensions = array<i32: 1>} : vector<1x5xi32>
    %301 = tpu.iota {dimensions = array<i32: 0>} : vector<5x1xi32>
    %302 = tpu.iota {dimensions = array<i32: 1>} : vector<5x5xi32>
    %303 = tpu.iota {dimensions = array<i32: 0>} : vector<5x5xi32>
    %304 = arith.cmpi eq, %303, %302 : vector<5x5xi32>
    %305 = vector.extract_strided_slice %299 {offsets = [0, 0], sizes = [1, 5], strides = [1, 1]} : vector<8x5xf32> to vector<1x5xf32>
    %cst_47 = arith.constant 0.000000e+00 : f32
    %306 = vector.shape_cast %305 : vector<1x5xf32> to vector<1x5xf32>
    %307 = vector.broadcast %306 : vector<1x5xf32> to vector<5x5xf32>
    %308 = vector.broadcast %cst_47 : f32 to vector<5x5xf32>
    %309 = arith.select %304, %307, %308 : vector<5x5xi1>, vector<5x5xf32>
    %cst_48 = arith.constant dense<0.000000e+00> : vector<5xf32>
    %310 = vector.multi_reduction <add>, %309, %cst_48 [1] : vector<5x5xf32> to vector<5xf32>
    %311 = vector.shape_cast %310 : vector<5xf32> to vector<5x1xf32>
    %312 = vector.extract_strided_slice %299 {offsets = [1, 0], sizes = [1, 5], strides = [1, 1]} : vector<8x5xf32> to vector<1x5xf32>
    %cst_49 = arith.constant 0.000000e+00 : f32
    %313 = vector.shape_cast %312 : vector<1x5xf32> to vector<1x5xf32>
    %314 = vector.broadcast %313 : vector<1x5xf32> to vector<5x5xf32>
    %315 = vector.broadcast %cst_49 : f32 to vector<5x5xf32>
    %316 = arith.select %304, %314, %315 : vector<5x5xi1>, vector<5x5xf32>
    %cst_50 = arith.constant dense<0.000000e+00> : vector<5xf32>
    %317 = vector.multi_reduction <add>, %316, %cst_50 [1] : vector<5x5xf32> to vector<5xf32>
    %318 = vector.shape_cast %317 : vector<5xf32> to vector<5x1xf32>
    %319 = vector.extract_strided_slice %299 {offsets = [2, 0], sizes = [1, 5], strides = [1, 1]} : vector<8x5xf32> to vector<1x5xf32>
    %cst_51 = arith.constant 0.000000e+00 : f32
    %320 = vector.shape_cast %319 : vector<1x5xf32> to vector<1x5xf32>
    %321 = vector.broadcast %320 : vector<1x5xf32> to vector<5x5xf32>
    %322 = vector.broadcast %cst_51 : f32 to vector<5x5xf32>
    %323 = arith.select %304, %321, %322 : vector<5x5xi1>, vector<5x5xf32>
    %cst_52 = arith.constant dense<0.000000e+00> : vector<5xf32>
    %324 = vector.multi_reduction <add>, %323, %cst_52 [1] : vector<5x5xf32> to vector<5xf32>
    %325 = vector.shape_cast %324 : vector<5xf32> to vector<5x1xf32>
    %326 = vector.extract_strided_slice %299 {offsets = [3, 0], sizes = [1, 5], strides = [1, 1]} : vector<8x5xf32> to vector<1x5xf32>
    %cst_53 = arith.constant 0.000000e+00 : f32
    %327 = vector.shape_cast %326 : vector<1x5xf32> to vector<1x5xf32>
    %328 = vector.broadcast %327 : vector<1x5xf32> to vector<5x5xf32>
    %329 = vector.broadcast %cst_53 : f32 to vector<5x5xf32>
    %330 = arith.select %304, %328, %329 : vector<5x5xi1>, vector<5x5xf32>
    %cst_54 = arith.constant dense<0.000000e+00> : vector<5xf32>
    %331 = vector.multi_reduction <add>, %330, %cst_54 [1] : vector<5x5xf32> to vector<5xf32>
    %332 = vector.shape_cast %331 : vector<5xf32> to vector<5x1xf32>
    %333 = vector.extract_strided_slice %299 {offsets = [4, 0], sizes = [1, 5], strides = [1, 1]} : vector<8x5xf32> to vector<1x5xf32>
    %cst_55 = arith.constant 0.000000e+00 : f32
    %334 = vector.shape_cast %333 : vector<1x5xf32> to vector<1x5xf32>
    %335 = vector.broadcast %334 : vector<1x5xf32> to vector<5x5xf32>
    %336 = vector.broadcast %cst_55 : f32 to vector<5x5xf32>
    %337 = arith.select %304, %335, %336 : vector<5x5xi1>, vector<5x5xf32>
    %cst_56 = arith.constant dense<0.000000e+00> : vector<5xf32>
    %338 = vector.multi_reduction <add>, %337, %cst_56 [1] : vector<5x5xf32> to vector<5xf32>
    %339 = vector.shape_cast %338 : vector<5xf32> to vector<5x1xf32>
    %340 = vector.extract_strided_slice %299 {offsets = [5, 0], sizes = [1, 5], strides = [1, 1]} : vector<8x5xf32> to vector<1x5xf32>
    %cst_57 = arith.constant 0.000000e+00 : f32
    %341 = vector.shape_cast %340 : vector<1x5xf32> to vector<1x5xf32>
    %342 = vector.broadcast %341 : vector<1x5xf32> to vector<5x5xf32>
    %343 = vector.broadcast %cst_57 : f32 to vector<5x5xf32>
    %344 = arith.select %304, %342, %343 : vector<5x5xi1>, vector<5x5xf32>
    %cst_58 = arith.constant dense<0.000000e+00> : vector<5xf32>
    %345 = vector.multi_reduction <add>, %344, %cst_58 [1] : vector<5x5xf32> to vector<5xf32>
    %346 = vector.shape_cast %345 : vector<5xf32> to vector<5x1xf32>
    %347 = vector.extract_strided_slice %299 {offsets = [6, 0], sizes = [1, 5], strides = [1, 1]} : vector<8x5xf32> to vector<1x5xf32>
    %cst_59 = arith.constant 0.000000e+00 : f32
    %348 = vector.shape_cast %347 : vector<1x5xf32> to vector<1x5xf32>
    %349 = vector.broadcast %348 : vector<1x5xf32> to vector<5x5xf32>
    %350 = vector.broadcast %cst_59 : f32 to vector<5x5xf32>
    %351 = arith.select %304, %349, %350 : vector<5x5xi1>, vector<5x5xf32>
    %cst_60 = arith.constant dense<0.000000e+00> : vector<5xf32>
    %352 = vector.multi_reduction <add>, %351, %cst_60 [1] : vector<5x5xf32> to vector<5xf32>
    %353 = vector.shape_cast %352 : vector<5xf32> to vector<5x1xf32>
    %c3_i32_61 = arith.constant 3 : i32
    %354 = vector.broadcast %c3_i32_61 : i32 to vector<1x5xi32>
    %355 = arith.cmpi eq, %300, %354 : vector<1x5xi32>
    %cst_62 = arith.constant 0.000000e+00 : f32
    %cst_63 = arith.constant -1.000000e+04 : f32
    %356 = vector.broadcast %cst_62 : f32 to vector<1x5xf32>
    %357 = vector.broadcast %cst_63 : f32 to vector<1x5xf32>
    %358 = arith.select %355, %356, %357 : vector<1x5xi1>, vector<1x5xf32>
    %c3_i32_64 = arith.constant 3 : i32
    %359 = vector.broadcast %c3_i32_64 : i32 to vector<5x1xi32>
    %360 = arith.cmpi eq, %301, %359 : vector<5x1xi32>
    %cst_65 = arith.constant 0.000000e+00 : f32
    %cst_66 = arith.constant -1.000000e+04 : f32
    %361 = vector.broadcast %cst_65 : f32 to vector<5x1xf32>
    %362 = vector.broadcast %cst_66 : f32 to vector<5x1xf32>
    %363 = arith.select %360, %361, %362 : vector<5x1xi1>, vector<5x1xf32>
    %364 = vector.broadcast %363 : vector<5x1xf32> to vector<5x5xf32>
    %365 = arith.addf %364, %10 : vector<5x5xf32>
    %cst_67 = arith.constant dense<0xFF800000> : vector<5xf32>
    %366 = vector.multi_reduction <maximumf>, %365, %cst_67 [0] : vector<5x5xf32> to vector<5xf32>
    %367 = vector.shape_cast %366 : vector<5xf32> to vector<1x5xf32>
    %368 = vector.broadcast %358 : vector<1x5xf32> to vector<5x5xf32>
    %369 = arith.addf %368, %9 : vector<5x5xf32>
    %cst_68 = arith.constant dense<0xFF800000> : vector<5xf32>
    %370 = vector.multi_reduction <maximumf>, %369, %cst_68 [1] : vector<5x5xf32> to vector<5xf32>
    %371 = vector.shape_cast %370 : vector<5xf32> to vector<5x1xf32>
    %372 = vector.extract_strided_slice %299 {offsets = [0, 0], sizes = [1, 5], strides = [1, 1]} : vector<8x5xf32> to vector<1x5xf32>
    %373 = arith.addf %367, %372 : vector<1x5xf32>
    %374 = arith.addf %371, %311 : vector<5x1xf32>
    %375 = vector.broadcast %374 : vector<5x1xf32> to vector<5x5xf32>
    %376 = arith.addf %375, %10 : vector<5x5xf32>
    %cst_69 = arith.constant dense<0xFF800000> : vector<5xf32>
    %377 = vector.multi_reduction <maximumf>, %376, %cst_69 [0] : vector<5x5xf32> to vector<5xf32>
    %378 = vector.shape_cast %377 : vector<5xf32> to vector<1x5xf32>
    %379 = vector.broadcast %378 : vector<1x5xf32> to vector<5x5xf32>
    %380 = arith.cmpf oeq, %376, %379 : vector<5x5xf32>
    %c5_i32_70 = arith.constant 5 : i32
    %381 = vector.broadcast %c5_i32_70 : i32 to vector<5x5xi32>
    %382 = arith.select %380, %303, %381 : vector<5x5xi1>, vector<5x5xi32>
    %cst_71 = arith.constant dense<2147483647> : vector<5xi32>
    %383 = vector.multi_reduction <minsi>, %382, %cst_71 [0] : vector<5x5xi32> to vector<5xi32>
    %384 = vector.shape_cast %383 : vector<5xi32> to vector<1x5xi32>
    %385 = vector.broadcast %373 : vector<1x5xf32> to vector<5x5xf32>
    %386 = arith.addf %385, %9 : vector<5x5xf32>
    %cst_72 = arith.constant dense<0xFF800000> : vector<5xf32>
    %387 = vector.multi_reduction <maximumf>, %386, %cst_72 [1] : vector<5x5xf32> to vector<5xf32>
    %388 = vector.shape_cast %387 : vector<5xf32> to vector<5x1xf32>
    %389 = vector.extract_strided_slice %299 {offsets = [1, 0], sizes = [1, 5], strides = [1, 1]} : vector<8x5xf32> to vector<1x5xf32>
    %390 = arith.addf %378, %389 : vector<1x5xf32>
    %391 = arith.addf %388, %318 : vector<5x1xf32>
    %392 = vector.broadcast %391 : vector<5x1xf32> to vector<5x5xf32>
    %393 = arith.addf %392, %10 : vector<5x5xf32>
    %cst_73 = arith.constant dense<0xFF800000> : vector<5xf32>
    %394 = vector.multi_reduction <maximumf>, %393, %cst_73 [0] : vector<5x5xf32> to vector<5xf32>
    %395 = vector.shape_cast %394 : vector<5xf32> to vector<1x5xf32>
    %396 = vector.broadcast %395 : vector<1x5xf32> to vector<5x5xf32>
    %397 = arith.cmpf oeq, %393, %396 : vector<5x5xf32>
    %c5_i32_74 = arith.constant 5 : i32
    %398 = vector.broadcast %c5_i32_74 : i32 to vector<5x5xi32>
    %399 = arith.select %397, %303, %398 : vector<5x5xi1>, vector<5x5xi32>
    %cst_75 = arith.constant dense<2147483647> : vector<5xi32>
    %400 = vector.multi_reduction <minsi>, %399, %cst_75 [0] : vector<5x5xi32> to vector<5xi32>
    %401 = vector.shape_cast %400 : vector<5xi32> to vector<1x5xi32>
    %402 = vector.broadcast %390 : vector<1x5xf32> to vector<5x5xf32>
    %403 = arith.addf %402, %9 : vector<5x5xf32>
    %cst_76 = arith.constant dense<0xFF800000> : vector<5xf32>
    %404 = vector.multi_reduction <maximumf>, %403, %cst_76 [1] : vector<5x5xf32> to vector<5xf32>
    %405 = vector.shape_cast %404 : vector<5xf32> to vector<5x1xf32>
    %406 = vector.extract_strided_slice %299 {offsets = [2, 0], sizes = [1, 5], strides = [1, 1]} : vector<8x5xf32> to vector<1x5xf32>
    %407 = arith.addf %395, %406 : vector<1x5xf32>
    %408 = arith.addf %405, %325 : vector<5x1xf32>
    %409 = vector.broadcast %408 : vector<5x1xf32> to vector<5x5xf32>
    %410 = arith.addf %409, %10 : vector<5x5xf32>
    %cst_77 = arith.constant dense<0xFF800000> : vector<5xf32>
    %411 = vector.multi_reduction <maximumf>, %410, %cst_77 [0] : vector<5x5xf32> to vector<5xf32>
    %412 = vector.shape_cast %411 : vector<5xf32> to vector<1x5xf32>
    %413 = vector.broadcast %412 : vector<1x5xf32> to vector<5x5xf32>
    %414 = arith.cmpf oeq, %410, %413 : vector<5x5xf32>
    %c5_i32_78 = arith.constant 5 : i32
    %415 = vector.broadcast %c5_i32_78 : i32 to vector<5x5xi32>
    %416 = arith.select %414, %303, %415 : vector<5x5xi1>, vector<5x5xi32>
    %cst_79 = arith.constant dense<2147483647> : vector<5xi32>
    %417 = vector.multi_reduction <minsi>, %416, %cst_79 [0] : vector<5x5xi32> to vector<5xi32>
    %418 = vector.shape_cast %417 : vector<5xi32> to vector<1x5xi32>
    %419 = vector.broadcast %407 : vector<1x5xf32> to vector<5x5xf32>
    %420 = arith.addf %419, %9 : vector<5x5xf32>
    %cst_80 = arith.constant dense<0xFF800000> : vector<5xf32>
    %421 = vector.multi_reduction <maximumf>, %420, %cst_80 [1] : vector<5x5xf32> to vector<5xf32>
    %422 = vector.shape_cast %421 : vector<5xf32> to vector<5x1xf32>
    %423 = vector.extract_strided_slice %299 {offsets = [3, 0], sizes = [1, 5], strides = [1, 1]} : vector<8x5xf32> to vector<1x5xf32>
    %424 = arith.addf %412, %423 : vector<1x5xf32>
    %425 = arith.addf %422, %332 : vector<5x1xf32>
    %426 = vector.broadcast %425 : vector<5x1xf32> to vector<5x5xf32>
    %427 = arith.addf %426, %10 : vector<5x5xf32>
    %cst_81 = arith.constant dense<0xFF800000> : vector<5xf32>
    %428 = vector.multi_reduction <maximumf>, %427, %cst_81 [0] : vector<5x5xf32> to vector<5xf32>
    %429 = vector.shape_cast %428 : vector<5xf32> to vector<1x5xf32>
    %430 = vector.broadcast %429 : vector<1x5xf32> to vector<5x5xf32>
    %431 = arith.cmpf oeq, %427, %430 : vector<5x5xf32>
    %c5_i32_82 = arith.constant 5 : i32
    %432 = vector.broadcast %c5_i32_82 : i32 to vector<5x5xi32>
    %433 = arith.select %431, %303, %432 : vector<5x5xi1>, vector<5x5xi32>
    %cst_83 = arith.constant dense<2147483647> : vector<5xi32>
    %434 = vector.multi_reduction <minsi>, %433, %cst_83 [0] : vector<5x5xi32> to vector<5xi32>
    %435 = vector.shape_cast %434 : vector<5xi32> to vector<1x5xi32>
    %436 = vector.broadcast %424 : vector<1x5xf32> to vector<5x5xf32>
    %437 = arith.addf %436, %9 : vector<5x5xf32>
    %cst_84 = arith.constant dense<0xFF800000> : vector<5xf32>
    %438 = vector.multi_reduction <maximumf>, %437, %cst_84 [1] : vector<5x5xf32> to vector<5xf32>
    %439 = vector.shape_cast %438 : vector<5xf32> to vector<5x1xf32>
    %440 = vector.extract_strided_slice %299 {offsets = [4, 0], sizes = [1, 5], strides = [1, 1]} : vector<8x5xf32> to vector<1x5xf32>
    %441 = arith.addf %429, %440 : vector<1x5xf32>
    %442 = arith.addf %439, %339 : vector<5x1xf32>
    %443 = vector.broadcast %442 : vector<5x1xf32> to vector<5x5xf32>
    %444 = arith.addf %443, %10 : vector<5x5xf32>
    %cst_85 = arith.constant dense<0xFF800000> : vector<5xf32>
    %445 = vector.multi_reduction <maximumf>, %444, %cst_85 [0] : vector<5x5xf32> to vector<5xf32>
    %446 = vector.shape_cast %445 : vector<5xf32> to vector<1x5xf32>
    %447 = vector.broadcast %446 : vector<1x5xf32> to vector<5x5xf32>
    %448 = arith.cmpf oeq, %444, %447 : vector<5x5xf32>
    %c5_i32_86 = arith.constant 5 : i32
    %449 = vector.broadcast %c5_i32_86 : i32 to vector<5x5xi32>
    %450 = arith.select %448, %303, %449 : vector<5x5xi1>, vector<5x5xi32>
    %cst_87 = arith.constant dense<2147483647> : vector<5xi32>
    %451 = vector.multi_reduction <minsi>, %450, %cst_87 [0] : vector<5x5xi32> to vector<5xi32>
    %452 = vector.shape_cast %451 : vector<5xi32> to vector<1x5xi32>
    %453 = vector.broadcast %441 : vector<1x5xf32> to vector<5x5xf32>
    %454 = arith.addf %453, %9 : vector<5x5xf32>
    %cst_88 = arith.constant dense<0xFF800000> : vector<5xf32>
    %455 = vector.multi_reduction <maximumf>, %454, %cst_88 [1] : vector<5x5xf32> to vector<5xf32>
    %456 = vector.shape_cast %455 : vector<5xf32> to vector<5x1xf32>
    %457 = vector.extract_strided_slice %299 {offsets = [5, 0], sizes = [1, 5], strides = [1, 1]} : vector<8x5xf32> to vector<1x5xf32>
    %458 = arith.addf %446, %457 : vector<1x5xf32>
    %459 = arith.addf %456, %346 : vector<5x1xf32>
    %460 = vector.broadcast %459 : vector<5x1xf32> to vector<5x5xf32>
    %461 = arith.addf %460, %10 : vector<5x5xf32>
    %cst_89 = arith.constant dense<0xFF800000> : vector<5xf32>
    %462 = vector.multi_reduction <maximumf>, %461, %cst_89 [0] : vector<5x5xf32> to vector<5xf32>
    %463 = vector.shape_cast %462 : vector<5xf32> to vector<1x5xf32>
    %464 = vector.broadcast %463 : vector<1x5xf32> to vector<5x5xf32>
    %465 = arith.cmpf oeq, %461, %464 : vector<5x5xf32>
    %c5_i32_90 = arith.constant 5 : i32
    %466 = vector.broadcast %c5_i32_90 : i32 to vector<5x5xi32>
    %467 = arith.select %465, %303, %466 : vector<5x5xi1>, vector<5x5xi32>
    %cst_91 = arith.constant dense<2147483647> : vector<5xi32>
    %468 = vector.multi_reduction <minsi>, %467, %cst_91 [0] : vector<5x5xi32> to vector<5xi32>
    %469 = vector.shape_cast %468 : vector<5xi32> to vector<1x5xi32>
    %470 = vector.broadcast %458 : vector<1x5xf32> to vector<5x5xf32>
    %471 = arith.addf %470, %9 : vector<5x5xf32>
    %cst_92 = arith.constant dense<0xFF800000> : vector<5xf32>
    %472 = vector.multi_reduction <maximumf>, %471, %cst_92 [1] : vector<5x5xf32> to vector<5xf32>
    %473 = vector.shape_cast %472 : vector<5xf32> to vector<5x1xf32>
    %474 = arith.addf %473, %353 : vector<5x1xf32>
    %475 = vector.broadcast %474 : vector<5x1xf32> to vector<5x5xf32>
    %476 = arith.addf %475, %10 : vector<5x5xf32>
    %cst_93 = arith.constant dense<0xFF800000> : vector<5xf32>
    %477 = vector.multi_reduction <maximumf>, %476, %cst_93 [0] : vector<5x5xf32> to vector<5xf32>
    %478 = vector.shape_cast %477 : vector<5xf32> to vector<1x5xf32>
    %479 = vector.broadcast %478 : vector<1x5xf32> to vector<5x5xf32>
    %480 = arith.cmpf oeq, %476, %479 : vector<5x5xf32>
    %c5_i32_94 = arith.constant 5 : i32
    %481 = vector.broadcast %c5_i32_94 : i32 to vector<5x5xi32>
    %482 = arith.select %480, %303, %481 : vector<5x5xi1>, vector<5x5xi32>
    %cst_95 = arith.constant dense<2147483647> : vector<5xi32>
    %483 = vector.multi_reduction <minsi>, %482, %cst_95 [0] : vector<5x5xi32> to vector<5xi32>
    %484 = vector.shape_cast %483 : vector<5xi32> to vector<1x5xi32>
    %485 = vector.extract_strided_slice %299 {offsets = [7, 0], sizes = [1, 5], strides = [1, 1]} : vector<8x5xf32> to vector<1x5xf32>
    %486 = arith.addf %478, %485 : vector<1x5xf32>
    %487 = vector.extract_strided_slice %9 {offsets = [4, 0], sizes = [1, 5], strides = [1, 1]} : vector<5x5xf32> to vector<1x5xf32>
    %488 = arith.addf %486, %487 : vector<1x5xf32>
    %cst_96 = arith.constant dense<0xFF800000> : vector<1xf32>
    %489 = vector.multi_reduction <maximumf>, %488, %cst_96 [1] : vector<1x5xf32> to vector<1xf32>
    %490 = vector.shape_cast %489 : vector<1xf32> to vector<1x1xf32>
    %491 = vector.broadcast %490 : vector<1x1xf32> to vector<1x5xf32>
    %492 = arith.cmpf oeq, %488, %491 : vector<1x5xf32>
    %c5_i32_97 = arith.constant 5 : i32
    %493 = vector.broadcast %c5_i32_97 : i32 to vector<1x5xi32>
    %494 = arith.select %492, %300, %493 : vector<1x5xi1>, vector<1x5xi32>
    %cst_98 = arith.constant dense<2147483647> : vector<1xi32>
    %495 = vector.multi_reduction <minsi>, %494, %cst_98 [1] : vector<1x5xi32> to vector<1xi32>
    %496 = vector.shape_cast %495 : vector<1xi32> to vector<1x1xi32>
    %c0_99 = arith.constant 0 : index
    %c0_100 = arith.constant 0 : index
    %497 = vector.load %arg3[%c0_99, %c0_100] : memref<1x1xf32, #tpu.memory_space<vmem>>, vector<1x1xf32>
    tpu.vector_store %arg3[%c0_99, %c0_100], %490 {strides = array<i32>} : memref<1x1xf32, #tpu.memory_space<vmem>>, vector<1x1xf32>,
    %498 = tpu.iota {dimensions = array<i32: 1>} : vector<1x8xi32>
    %c0_i32_101 = arith.constant 0 : i32
    %499 = vector.broadcast %c0_i32_101 : i32 to vector<1x8xi32>
    %500 = vector.broadcast %496 : vector<1x1xi32> to vector<1x5xi32>
    %501 = arith.cmpi eq, %300, %500 : vector<1x5xi32>
    %c7_i32_102 = arith.constant 7 : i32
    %502 = vector.broadcast %c7_i32_102 : i32 to vector<1x8xi32>
    %503 = arith.cmpi eq, %498, %502 : vector<1x8xi32>
    %504 = vector.shape_cast %496 : vector<1x1xi32> to vector<1x1xi32>
    %505 = vector.broadcast %504 : vector<1x1xi32> to vector<1x8xi32>
    %506 = arith.select %503, %505, %499 : vector<1x8xi1>, vector<1x8xi32>
    %c0_i32_103 = arith.constant 0 : i32
    %507 = vector.broadcast %c0_i32_103 : i32 to vector<1x5xi32>
    %508 = arith.select %501, %484, %507 : vector<1x5xi1>, vector<1x5xi32>
    %cst_104 = arith.constant dense<0> : vector<1xi32>
    %509 = vector.multi_reduction <add>, %508, %cst_104 [1] : vector<1x5xi32> to vector<1xi32>
    %510 = vector.shape_cast %509 : vector<1xi32> to vector<1x1xi32>
    %511 = vector.broadcast %510 : vector<1x1xi32> to vector<1x5xi32>
    %512 = arith.cmpi eq, %300, %511 : vector<1x5xi32>
    %c6_i32_105 = arith.constant 6 : i32
    %513 = vector.broadcast %c6_i32_105 : i32 to vector<1x8xi32>
    %514 = arith.cmpi eq, %498, %513 : vector<1x8xi32>
    %515 = vector.shape_cast %510 : vector<1x1xi32> to vector<1x1xi32>
    %516 = vector.broadcast %515 : vector<1x1xi32> to vector<1x8xi32>
    %517 = arith.select %514, %516, %506 : vector<1x8xi1>, vector<1x8xi32>
    %c0_i32_106 = arith.constant 0 : i32
    %518 = vector.broadcast %c0_i32_106 : i32 to vector<1x5xi32>
    %519 = arith.select %512, %469, %518 : vector<1x5xi1>, vector<1x5xi32>
    %cst_107 = arith.constant dense<0> : vector<1xi32>
    %520 = vector.multi_reduction <add>, %519, %cst_107 [1] : vector<1x5xi32> to vector<1xi32>
    %521 = vector.shape_cast %520 : vector<1xi32> to vector<1x1xi32>
    %522 = vector.broadcast %521 : vector<1x1xi32> to vector<1x5xi32>
    %523 = arith.cmpi eq, %300, %522 : vector<1x5xi32>
    %c5_i32_108 = arith.constant 5 : i32
    %524 = vector.broadcast %c5_i32_108 : i32 to vector<1x8xi32>
    %525 = arith.cmpi eq, %498, %524 : vector<1x8xi32>
    %526 = vector.shape_cast %521 : vector<1x1xi32> to vector<1x1xi32>
    %527 = vector.broadcast %526 : vector<1x1xi32> to vector<1x8xi32>
    %528 = arith.select %525, %527, %517 : vector<1x8xi1>, vector<1x8xi32>
    %c0_i32_109 = arith.constant 0 : i32
    %529 = vector.broadcast %c0_i32_109 : i32 to vector<1x5xi32>
    %530 = arith.select %523, %452, %529 : vector<1x5xi1>, vector<1x5xi32>
    %cst_110 = arith.constant dense<0> : vector<1xi32>
    %531 = vector.multi_reduction <add>, %530, %cst_110 [1] : vector<1x5xi32> to vector<1xi32>
    %532 = vector.shape_cast %531 : vector<1xi32> to vector<1x1xi32>
    %533 = vector.broadcast %532 : vector<1x1xi32> to vector<1x5xi32>
    %534 = arith.cmpi eq, %300, %533 : vector<1x5xi32>
    %c4_i32_111 = arith.constant 4 : i32
    %535 = vector.broadcast %c4_i32_111 : i32 to vector<1x8xi32>
    %536 = arith.cmpi eq, %498, %535 : vector<1x8xi32>
    %537 = vector.shape_cast %532 : vector<1x1xi32> to vector<1x1xi32>
    %538 = vector.broadcast %537 : vector<1x1xi32> to vector<1x8xi32>
    %539 = arith.select %536, %538, %528 : vector<1x8xi1>, vector<1x8xi32>
    %c0_i32_112 = arith.constant 0 : i32
    %540 = vector.broadcast %c0_i32_112 : i32 to vector<1x5xi32>
    %541 = arith.select %534, %435, %540 : vector<1x5xi1>, vector<1x5xi32>
    %cst_113 = arith.constant dense<0> : vector<1xi32>
    %542 = vector.multi_reduction <add>, %541, %cst_113 [1] : vector<1x5xi32> to vector<1xi32>
    %543 = vector.shape_cast %542 : vector<1xi32> to vector<1x1xi32>
    %544 = vector.broadcast %543 : vector<1x1xi32> to vector<1x5xi32>
    %545 = arith.cmpi eq, %300, %544 : vector<1x5xi32>
    %c3_i32_114 = arith.constant 3 : i32
    %546 = vector.broadcast %c3_i32_114 : i32 to vector<1x8xi32>
    %547 = arith.cmpi eq, %498, %546 : vector<1x8xi32>
    %548 = vector.shape_cast %543 : vector<1x1xi32> to vector<1x1xi32>
    %549 = vector.broadcast %548 : vector<1x1xi32> to vector<1x8xi32>
    %550 = arith.select %547, %549, %539 : vector<1x8xi1>, vector<1x8xi32>
    %c0_i32_115 = arith.constant 0 : i32
    %551 = vector.broadcast %c0_i32_115 : i32 to vector<1x5xi32>
    %552 = arith.select %545, %418, %551 : vector<1x5xi1>, vector<1x5xi32>
    %cst_116 = arith.constant dense<0> : vector<1xi32>
    %553 = vector.multi_reduction <add>, %552, %cst_116 [1] : vector<1x5xi32> to vector<1xi32>
    %554 = vector.shape_cast %553 : vector<1xi32> to vector<1x1xi32>
    %555 = vector.broadcast %554 : vector<1x1xi32> to vector<1x5xi32>
    %556 = arith.cmpi eq, %300, %555 : vector<1x5xi32>
    %c2_i32_117 = arith.constant 2 : i32
    %557 = vector.broadcast %c2_i32_117 : i32 to vector<1x8xi32>
    %558 = arith.cmpi eq, %498, %557 : vector<1x8xi32>
    %559 = vector.shape_cast %554 : vector<1x1xi32> to vector<1x1xi32>
    %560 = vector.broadcast %559 : vector<1x1xi32> to vector<1x8xi32>
    %561 = arith.select %558, %560, %550 : vector<1x8xi1>, vector<1x8xi32>
    %c0_i32_118 = arith.constant 0 : i32
    %562 = vector.broadcast %c0_i32_118 : i32 to vector<1x5xi32>
    %563 = arith.select %556, %401, %562 : vector<1x5xi1>, vector<1x5xi32>
    %cst_119 = arith.constant dense<0> : vector<1xi32>
    %564 = vector.multi_reduction <add>, %563, %cst_119 [1] : vector<1x5xi32> to vector<1xi32>
    %565 = vector.shape_cast %564 : vector<1xi32> to vector<1x1xi32>
    %566 = vector.broadcast %565 : vector<1x1xi32> to vector<1x5xi32>
    %567 = arith.cmpi eq, %300, %566 : vector<1x5xi32>
    %c1_i32_120 = arith.constant 1 : i32
    %568 = vector.broadcast %c1_i32_120 : i32 to vector<1x8xi32>
    %569 = arith.cmpi eq, %498, %568 : vector<1x8xi32>
    %570 = vector.shape_cast %565 : vector<1x1xi32> to vector<1x1xi32>
    %571 = vector.broadcast %570 : vector<1x1xi32> to vector<1x8xi32>
    %572 = arith.select %569, %571, %561 : vector<1x8xi1>, vector<1x8xi32>
    %c0_i32_121 = arith.constant 0 : i32
    %573 = vector.broadcast %c0_i32_121 : i32 to vector<1x5xi32>
    %574 = arith.select %567, %384, %573 : vector<1x5xi1>, vector<1x5xi32>
    %cst_122 = arith.constant dense<0> : vector<1xi32>
    %575 = vector.multi_reduction <add>, %574, %cst_122 [1] : vector<1x5xi32> to vector<1xi32>
    %576 = vector.shape_cast %575 : vector<1xi32> to vector<1x1xi32>
    %c0_i32_123 = arith.constant 0 : i32
    %577 = vector.broadcast %c0_i32_123 : i32 to vector<1x8xi32>
    %578 = arith.cmpi eq, %498, %577 : vector<1x8xi32>
    %579 = vector.shape_cast %576 : vector<1x1xi32> to vector<1x1xi32>
    %580 = vector.broadcast %579 : vector<1x1xi32> to vector<1x8xi32>
    %581 = arith.select %578, %580, %572 : vector<1x8xi1>, vector<1x8xi32>
    %c0_124 = arith.constant 0 : index
    %c0_125 = arith.constant 0 : index
    %582 = vector.load %arg4[%c0_124, %c0_125] : memref<1x8xi32, #tpu.memory_space<vmem>>, vector<1x8xi32>
    tpu.vector_store %arg4[%c0_124, %c0_125], %581 {strides = array<i32>} : memref<1x8xi32, #tpu.memory_space<vmem>>, vector<1x8xi32>,
    return
  }
}

</mosaic_0001>

<bundles_post_ra>
// kernel: tpu_custom_call.1
= control target key start
LH: loop header
LB: loop body
LE: loop exit
PB: predicated region body
PF: predicated region fallthrough
CT: control target
= control target key end

     0   :  { %10 = vsyncpa [#allocation3], 0  ;;  %s2619_s0 = inlined_call_operand.hbm [shape: f32[8,16], index: 0, kind: input, shape index: {}]   ;;  %s2620_s1 = inlined_call_operand.vmem [shape: f32[51,128], index: 1, kind: input, shape index: {}]   ;;  %s2621_s2 = inlined_call_operand.vmem [shape: f32[43,5], index: 2, kind: input, shape index: {}]   ;;  %s2622_s3 = inlined_call_operand.hbm [shape: f32[1,1], index: 3, kind: output, shape index: {0}]   ;;  %s2623_s4 = inlined_call_operand.hbm [shape: s32[1,8], index: 4, kind: output, shape index: {1}]  }
   0x1   :  { %11 = vsyncpa [#allocation4], 0 }
   0x2   :  { %12 = vsyncpa [#allocation7], 0  ;;  %s1954_s15 = smov [#allocation2]  }
   0x3   :  { %s19_s16 = sshll.u32 %s1954_s15, 4  ;;  %s20_s16 = int_to_ptr.vmem [resolvable:$true] %s19_s16 }
   0x4   :  { %s1896_s17 = scalar_lea.vmem %s20_s16, 128  ;;  %p1901_p1 = scmp.lt.s32.totalorder %s20_s16, %s20_s16 }
   0x5   :  { %p1897_p0 = scmp.ne.s32.totalorder %s20_s16, %s1896_s17  ;;  %p1902_p2 = scmp.lt.s32.totalorder %s1896_s17, %s1896_s17 }
   0x7   :  { %p1903_p3 = por %p1902_p2, %p1901_p1 }
   0x9   :  { %p1904_p4 = pnand %p1903_p3, %p1897_p0 }
   0xb   :  { %1907 = shalt.err (!%p1904_p4)
}
   0xc   :  { %22 = dma.hbm_to_vmem [thread:$0]  %s2619_s0, 128, %s20_s16, [#allocation3]  }
   0xd   :  { %1948 = dma.done.wait [#allocation3], 128  }
   0xe   :  { %1949 = vsyncadd [#allocation3], 4294967168  ;;  %v1955_v0 = vmov 0.0   ;;  %vm1956_vm0 = vmmov 0   ;;  %v31_v1 = vld [vmem:[%s2620_s1 + $0x8] sm:$0xff]  ;;  %v30_v3 = vld [vmem:[%s2620_s1] sm:$0xff]  ;;  %v125_v9 = vlaneseq }
   0xf   :  { %1709 = vmatprep.subr.mxu0 %v1955_v0  ;;  %1716 = vmatprep.subr.mxu1 %v1955_v0  ;;  %v2003_v2 = vld [vmem:[%s2620_s1 + $0x28] sm:$0xff]  ;;  %v2012_v4 = vld [vmem:[%s2620_s1 + $0x20] sm:$0xff]  ;;  %vm51_vm1 = vcmask 130048   ;;  %v2019_v6 = vld [vmem:[%s2620_s1 + $0x18] sm:$0xff]  ;;  %vm2624_vm2 = vcmask 261120   ;;  %s1957_s9 = smov 32  }
  0x10   :  { %1713 = vmatprep.mubr.msk.f32.mxu0 %vm1956_vm0, %v1955_v0  ;;  %1724 = vmatprep.mubr.msk.f32.mxu1 %vm1956_vm0, %v1955_v0  ;;  %v46_v5 = vld [vmem:[#allocation2] sm:$0xff]  ;;  %v2026_v7 = vld [vmem:[%s2620_s1 + $0x10] sm:$0xff]  ;;  %v2058_v10 = vand.u32 127, %v125_v9 }
  0x11   :  { %1710 = vmatpush3.msra.mxu0 %v31_v1  ;;  %1717 = vmatpush3.msra.mxu1 %v2003_v2  ;;  %v37_v8 = vld [vmem:[%s2620_s1 + $0x31] sm:$0x1]  ;;  %v1641_v11 = vld [vmem:[%s2620_s1 + $0x30] ss:$0 sm:$0xff]  ;;  %v38_v27 = vld [vmem:[%s2620_s1 + $0x32] sm:$0x1] }
  0x12   :  { %1711 = vmatprep.subr.mxu0 %v1955_v0  ;;  %1718 = vmatprep.subr.mxu1 %v1955_v0  ;;  %vm128_vm3 = vcmp.ge.s32.totalorder %v2058_v10, 32  ;;  %vm129_vm4 = vcmp.lt.s32.totalorder %v2058_v10, 48  ;;  %vm127_vm5 = vcmp.lt.s32.totalorder %v2058_v10, 16  ;;  %vm132_vm7 = vcmp.ge.s32.totalorder %v2058_v10, 64  ;;  %s1958_s1 = smov 64  }
  0x13   :  { %1712 = vmatpush3.msra.mxu0 %v30_v3  ;;  %1719 = vmatpush3.msra.mxu1 %v2012_v4  ;;  %vm130_vm6 = vmand %vm128_vm3, %vm129_vm4  ;;  %vm133_vm8 = vcmp.lt.s32.totalorder %v2058_v10, 80  ;;  %vm136_vm11 = vcmp.ge.s32.totalorder %v2058_v10, 96  ;;  %vm137_vm12 = vcmp.lt.s32.totalorder %v2058_v10, 112 }
  0x14   :  { %1714 = vmatmul.mubr.msk.f32.vlgmr.msra.gmra.mxu0 %vm51_vm1, %v46_v5  ;;  %1720 = vmatprep.subr.mxu1 %v1955_v0  ;;  %vm131_vm9 = vmor %vm127_vm5, %vm130_vm6  ;;  %vm1959_vm1 = vmmov 1  }
  0x15   :  { %1721 = vmatpush3.msra.mxu1 %v2019_v6  ;;  %1727 = vmatprep.subr.mxu0 %v1955_v0  ;;  %vm134_vm10 = vmand %vm132_vm7, %vm133_vm8 }
  0x16   :  { %1722 = vmatprep.subr.mxu1 %v1955_v0  ;;  %1728 = vmatpush3.msra.mxu0 %v2003_v2  ;;  %vm135_vm13 = vmor %vm131_vm9, %vm134_vm10 }
  0x17   :  { %1723 = vmatpush3.msra.mxu1 %v2026_v7  ;;  %1729 = vmatprep.subr.mxu0 %v1955_v0  ;;  %vm138_vm14 = vmand %vm136_vm11, %vm137_vm12 }
  0x18   :  { %1725 = vmatmul.mubr.msk.f32.vlgmr.msra.gmra.mxu1 %vm2624_vm2, %v37_v8  ;;  %1730 = vmatpush3.msra.mxu0 %v2012_v4  ;;  %vm139_vm15 = vmor %vm135_vm13, %vm138_vm14 }
  0x19   :  { %1731 = vmatprep.subr.mxu0 %v1955_v0  ;;  %1735 = vmatprep.mubr.msk.f32.mxu0 %vm1956_vm0, %v1955_v0  ;;  %vm2262_vm3 = vmxor %vm127_vm5, %vm1959_vm1 }
  0x1a   :  { %1732 = vmatpush3.msra.mxu0 %v2019_v6  ;;  %1738 = vmatprep.subr.mxu1 %v1955_v0 }
  0x1b   :  { %1733 = vmatprep.subr.mxu0 %v1955_v0  ;;  %1739 = vmatpush3.msra.mxu1 %v2003_v2 }
  0x1c   :  { %1734 = vmatpush3.msra.mxu0 %v2026_v7  ;;  %1740 = vmatprep.subr.mxu1 %v1955_v0 }
  0x1d   :  { %1741 = vmatpush3.msra.mxu1 %v2012_v4  ;;  %1746 = vmatprep.mubr.msk.f32.mxu1 %vm1956_vm0, %v1955_v0 }
  0x1e   :  { %1742 = vmatprep.subr.mxu1 %v1955_v0  ;;  %1749 = vmatprep.subr.mxu0 %v1955_v0 }
  0x1f   :  { %1743 = vmatpush3.msra.mxu1 %v2019_v6 }
  0x20   :  { %1744 = vmatprep.subr.mxu1 %v1955_v0 }
  0x21   :  { %1745 = vmatpush3.msra.mxu1 %v2026_v7 }
  0x22   :  { %1760 = vmatprep.subr.mxu1 %v1955_v0 }
  0xd4   :  { %v121_v12 = vpop.f32.mrf.mxu0 }
  0xd5   :  { %v122_v13 = vadd.f32 %v1641_v11, %v121_v12 }
  0xd6   :  { %v1715_v14 = vpop.f32.mrf.mxu0 }
  0xd7   :  { %v143_v15 = vrot.slane %v122_v13, 7  ;;  %v264_v16 = vrot.slane %v122_v13, 5  ;;  %v387_v17 = vrot.slane %v122_v13, 3  ;;  %v511_v18 = vrot.slane %v122_v13, 1 }
  0xd8   :  { %v216_v19 = vpop.f32.mrf.mxu1 }
  0xd9   :  { %v2072_v20 = vsel %vm139_vm15, %v122_v13, %v143_v15  ;;  %v2074_v21 = vsel %vm139_vm15, %v122_v13, %v264_v16  ;;  %v2076_v22 = vsel %vm139_vm15, %v122_v13, %v387_v17  ;;  %v2078_v23 = vsel %vm139_vm15, %v122_v13, %v511_v18 }
  0xda   :  { %v220_v24 = vadd.f32 %v216_v19, %v2072_v20  ;;  %v1726_v25 = vpop.f32.mrf.mxu1 }
  0xdc   :  { %1824 = vtanh.f32 %v220_v24  ;;  %v1644_v28 = vmul.f32 -1.442695, %v220_v24 }
  0xde   :  { %1826 = vpow2.f32 %v1644_v28 }
  0xe9   :  { %v1825_v26 = vpop.eup %1824 }
  0xea   :  { %234 = vrot.lane.b32.xlu0 %v1825_v26, %s1957_s9 }
  0xeb   :  { %v1827_v29 = vpop.eup %1826 }
  0xec   :  { %v224_v30 = vadd.f32 1.0, %v1827_v29 }
  0xee   :  { %229 = vrot.lane.b32.xlu0 %v38_v27, %s1957_s9  ;;  %1828 = vrcp.f32 %v224_v30 }
  0xfb   :  { %v1829_v31 = vpop.eup %1828 }
 0x15c   :  { %v235_v32 = vpop.permute.xlu0 %234 }
 0x15d   :  { %v237_v33 = vmul.f32 %v1829_v31, %v235_v32 }
 0x15f   :  { %239 = vrot.lane.b32.xlu1 %v237_v33, %s1957_s9 }
 0x160   :  { %v230_v34 = vpop.permute.xlu0 %229 }
 0x161   :  { %v232_v35 = vmul.f32 %v1829_v31, %v230_v34 }
 0x1d1   :  { %v240_v36 = vpop.permute.xlu1 %239 }
 0x1d2   :  { %v242_v37 = vadd.f32 %v240_v36, %v232_v35 }
 0x1d4   :  { %1830 = vtanh.f32 %v242_v37  ;;  %v354_v53 = vrot.slane %v242_v37, 7 }
 0x1e1   :  { %v1831_v38 = vpop.eup %1830 }
 0x1e2   :  { %245 = vrot.lane.b32.xlu1 %v1831_v38, %s1957_s9 }
 0x254   :  { %v246_v39 = vpop.permute.xlu1 %245 }
 0x255   :  { %v2088_v40 = vmul.f32 %v1829_v31, %v246_v39 }
 0x257   :  { %268 = vrot.lane.b32.xlu0 %v2088_v40, %s1958_s1 }
 0x2c9   :  { %v269_v41 = vpop.permute.xlu0 %268 }
 0x2ca   :  { %1736 = vmatmul.mubr.msk.f32.vlgmr.msra.gmra.mxu0 %vm2624_vm2, %v269_v41 }
 0x2cb   :  { %1750 = vmatpush3.msra.mxu0 %v2003_v2  ;;  %1757 = vmatprep.mubr.msk.f32.mxu0 %vm1956_vm0, %v1955_v0 }
 0x2cc   :  { %1751 = vmatprep.subr.mxu0 %v1955_v0 }
 0x2cd   :  { %1752 = vmatpush3.msra.mxu0 %v2012_v4 }
 0x2ce   :  { %1753 = vmatprep.subr.mxu0 %v1955_v0 }
 0x2cf   :  { %1754 = vmatpush3.msra.mxu0 %v2019_v6 }
 0x2d0   :  { %1755 = vmatprep.subr.mxu0 %v1955_v0 }
 0x2d1   :  { %1756 = vmatpush3.msra.mxu0 %v2026_v7 }
 0x2d2   :  { %1771 = vmatprep.subr.mxu0 %v1955_v0 }
 0x38a   :  { %v338_v42 = vpop.f32.mrf.mxu0 }
 0x38b   :  { %v343_v43 = vrot.slane %v338_v42, 7 }
 0x38c   :  { %v1737_v44 = vpop.f32.mrf.mxu0 }
 0x38d   :  { %v345_v45 = vadd.f32 %v343_v43, %v2074_v21 }
 0x38f   :  { %1832 = vtanh.f32 %v345_v45  ;;  %v1646_v47 = vmul.f32 -1.442695, %v345_v45 }
 0x391   :  { %1834 = vpow2.f32 %v1646_v47 }
 0x39c   :  { %v1833_v46 = vpop.eup %1832 }
 0x39d   :  { %358 = vrot.lane.b32.xlu1 %v1833_v46, %s1957_s9 }
 0x39e   :  { %v1835_v48 = vpop.eup %1834 }
 0x39f   :  { %v349_v49 = vadd.f32 1.0, %v1835_v48 }
 0x3a1   :  { %1836 = vrcp.f32 %v349_v49 }
 0x3ae   :  { %v1837_v50 = vpop.eup %1836 }
 0x3af   :  { %v356_v54 = vmul.f32 %v1837_v50, %v354_v53 }
 0x40f   :  { %v359_v51 = vpop.permute.xlu1 %358 }
 0x410   :  { %v361_v52 = vmul.f32 %v1837_v50, %v359_v51 }
 0x412   :  { %363 = vrot.lane.b32.xlu0 %v361_v52, %s1957_s9 }
 0x484   :  { %v364_v55 = vpop.permute.xlu0 %363 }
 0x485   :  { %v366_v56 = vadd.f32 %v364_v55, %v356_v54 }
 0x487   :  { %1838 = vtanh.f32 %v366_v56  ;;  %v478_v16 = vrot.slane %v366_v56, 7 }
 0x494   :  { %v1839_v57 = vpop.eup %1838 }
 0x495   :  { %369 = vrot.lane.b32.xlu1 %v1839_v57, %s1957_s9 }
 0x507   :  { %v370_v58 = vpop.permute.xlu1 %369 }
 0x508   :  { %v2107_v59 = vmul.f32 %v1837_v50, %v370_v58 }
 0x50a   :  { %v391_v60 = vrot.slane %v2107_v59, 1 }
 0x50c   :  { %392 = vrot.lane.b32.xlu0 %v391_v60, %s1958_s1 }
 0x57e   :  { %v393_v61 = vpop.permute.xlu0 %392 }
 0x57f   :  { %1747 = vmatmul.mubr.msk.f32.vlgmr.msra.gmra.mxu1 %vm2624_vm2, %v393_v61 }
 0x580   :  { %1761 = vmatpush3.msra.mxu1 %v2003_v2  ;;  %1768 = vmatprep.mubr.msk.f32.mxu1 %vm1956_vm0, %v1955_v0 }
 0x581   :  { %1762 = vmatprep.subr.mxu1 %v1955_v0 }
 0x582   :  { %1763 = vmatpush3.msra.mxu1 %v2012_v4 }
 0x583   :  { %1764 = vmatprep.subr.mxu1 %v1955_v0 }
 0x584   :  { %1765 = vmatpush3.msra.mxu1 %v2019_v6 }
 0x585   :  { %1766 = vmatprep.subr.mxu1 %v1955_v0 }
 0x586   :  { %1767 = vmatpush3.msra.mxu1 %v2026_v7 }
 0x587   :  { %1782 = vmatprep.subr.mxu1 %v1955_v0 }
 0x63f   :  { %v462_v62 = vpop.f32.mrf.mxu1 }
 0x640   :  { %v467_v63 = vrot.slane %v462_v62, 6 }
 0x641   :  { %v1748_v1 = vpop.f32.mrf.mxu1 }
 0x642   :  { %v469_v3 = vadd.f32 %v467_v63, %v2076_v22 }
 0x644   :  { %1840 = vtanh.f32 %v469_v3  ;;  %v1648_v8 = vmul.f32 -1.442695, %v469_v3 }
 0x646   :  { %1842 = vpow2.f32 %v1648_v8 }
 0x651   :  { %v1841_v5 = vpop.eup %1840 }
 0x652   :  { %482 = vrot.lane.b32.xlu1 %v1841_v5, %s1957_s9 }
 0x653   :  { %v1843_v11 = vpop.eup %1842 }
 0x654   :  { %v473_v12 = vadd.f32 1.0, %v1843_v11 }
 0x656   :  { %1844 = vrcp.f32 %v473_v12 }
 0x663   :  { %v1845_v13 = vpop.eup %1844 }
 0x664   :  { %v480_v17 = vmul.f32 %v1845_v13, %v478_v16 }
 0x6c4   :  { %v483_v14 = vpop.permute.xlu1 %482 }
 0x6c5   :  { %v485_v15 = vmul.f32 %v1845_v13, %v483_v14 }
 0x6c7   :  { %487 = vrot.lane.b32.xlu0 %v485_v15, %s1957_s9 }
 0x739   :  { %v488_v18 = vpop.permute.xlu0 %487 }
 0x73a   :  { %v490_v19 = vadd.f32 %v488_v18, %v480_v17 }
 0x73c   :  { %1846 = vtanh.f32 %v490_v19  ;;  %v602_v41 = vrot.slane %v490_v19, 7 }
 0x749   :  { %v1847_v24 = vpop.eup %1846 }
 0x74a   :  { %493 = vrot.lane.b32.xlu1 %v1847_v24, %s1957_s9 }
 0x7bc   :  { %v494_v25 = vpop.permute.xlu1 %493 }
 0x7bd   :  { %v2126_v26 = vmul.f32 %v1845_v13, %v494_v25 }
 0x7bf   :  { %v515_v27 = vrot.slane %v2126_v26, 2 }
 0x7c1   :  { %516 = vrot.lane.b32.xlu0 %v515_v27, %s1958_s1 }
 0x833   :  { %v517_v28 = vpop.permute.xlu0 %516 }
 0x834   :  { %1758 = vmatmul.mubr.msk.f32.vlgmr.msra.gmra.mxu0 %vm2624_vm2, %v517_v28 }
 0x835   :  { %1772 = vmatpush3.msra.mxu0 %v2003_v2  ;;  %1779 = vmatprep.mubr.msk.f32.mxu0 %vm1956_vm0, %v1955_v0 }
 0x836   :  { %1773 = vmatprep.subr.mxu0 %v1955_v0 }
 0x837   :  { %1774 = vmatpush3.msra.mxu0 %v2012_v4 }
 0x838   :  { %1775 = vmatprep.subr.mxu0 %v1955_v0 }
 0x839   :  { %1776 = vmatpush3.msra.mxu0 %v2019_v6 }
 0x83a   :  { %1777 = vmatprep.subr.mxu0 %v1955_v0 }
 0x83b   :  { %1778 = vmatpush3.msra.mxu0 %v2026_v7 }
 0x83c   :  { %1793 = vmatprep.subr.mxu0 %v1955_v0 }
 0x8f4   :  { %v586_v29 = vpop.f32.mrf.mxu0 }
 0x8f5   :  { %v591_v30 = vrot.slane %v586_v29, 5 }
 0x8f6   :  { %v1759_v31 = vpop.f32.mrf.mxu0 }
 0x8f7   :  { %v593_v32 = vadd.f32 %v591_v30, %v2078_v23 }
 0x8f9   :  { %1848 = vtanh.f32 %v593_v32  ;;  %v1650_v34 = vmul.f32 -1.442695, %v593_v32 }
 0x8fb   :  { %1850 = vpow2.f32 %v1650_v34 }
 0x906   :  { %v1849_v33 = vpop.eup %1848 }
 0x907   :  { %606 = vrot.lane.b32.xlu1 %v1849_v33, %s1957_s9 }
 0x908   :  { %v1851_v35 = vpop.eup %1850 }
 0x909   :  { %v597_v36 = vadd.f32 1.0, %v1851_v35 }
 0x90b   :  { %1852 = vrcp.f32 %v597_v36 }
 0x918   :  { %v1853_v37 = vpop.eup %1852 }
 0x919   :  { %v604_v42 = vmul.f32 %v1853_v37, %v602_v41 }
 0x979   :  { %v607_v38 = vpop.permute.xlu1 %606 }
 0x97a   :  { %v609_v39 = vmul.f32 %v1853_v37, %v607_v38 }
 0x97c   :  { %611 = vrot.lane.b32.xlu0 %v609_v39, %s1957_s9 }
 0x9ee   :  { %v612_v43 = vpop.permute.xlu0 %611 }
 0x9ef   :  { %v614_v44 = vadd.f32 %v612_v43, %v604_v42 }
 0x9f1   :  { %1854 = vtanh.f32 %v614_v44  ;;  %v723_v62 = vrot.slane %v614_v44, 7 }
 0x9fe   :  { %v1855_v45 = vpop.eup %1854 }
 0x9ff   :  { %617 = vrot.lane.b32.xlu1 %v1855_v45, %s1957_s9 }
 0xa71   :  { %v618_v46 = vpop.permute.xlu1 %617 }
 0xa72   :  { %v2145_v47 = vmul.f32 %v1853_v37, %v618_v46 }
 0xa74   :  { %v636_v48 = vrot.slane %v2145_v47, 3 }
 0xa76   :  { %637 = vrot.lane.b32.xlu0 %v636_v48, %s1958_s1 }
 0xae8   :  { %v638_v49 = vpop.permute.xlu0 %637 }
 0xae9   :  { %1769 = vmatmul.mubr.msk.f32.vlgmr.msra.gmra.mxu1 %vm2624_vm2, %v638_v49 }
 0xaea   :  { %1783 = vmatpush3.msra.mxu1 %v2003_v2  ;;  %1790 = vmatprep.mubr.msk.f32.mxu1 %vm1956_vm0, %v1955_v0 }
 0xaeb   :  { %1784 = vmatprep.subr.mxu1 %v1955_v0 }
 0xaec   :  { %1785 = vmatpush3.msra.mxu1 %v2012_v4 }
 0xaed   :  { %1786 = vmatprep.subr.mxu1 %v1955_v0 }
 0xaee   :  { %1787 = vmatpush3.msra.mxu1 %v2019_v6 }
 0xaef   :  { %1788 = vmatprep.subr.mxu1 %v1955_v0 }
 0xaf0   :  { %1789 = vmatpush3.msra.mxu1 %v2026_v7 }
 0xaf1   :  { %1804 = vmatprep.subr.mxu1 %v1955_v0 }
 0xba9   :  { %v707_v50 = vpop.f32.mrf.mxu1 }
 0xbaa   :  { %v712_v51 = vrot.slane %v707_v50, 4 }
 0xbab   :  { %v1770_v52 = vpop.f32.mrf.mxu1 }
 0xbac   :  { %v714_v53 = vadd.f32 %v712_v51, %v2072_v20 }
 0xbae   :  { %1856 = vtanh.f32 %v714_v53  ;;  %v1652_v55 = vmul.f32 -1.442695, %v714_v53 }
 0xbb0   :  { %1858 = vpow2.f32 %v1652_v55 }
 0xbbb   :  { %v1857_v54 = vpop.eup %1856 }
 0xbbc   :  { %727 = vrot.lane.b32.xlu1 %v1857_v54, %s1957_s9 }
 0xbbd   :  { %v1859_v56 = vpop.eup %1858 }
 0xbbe   :  { %v718_v57 = vadd.f32 1.0, %v1859_v56 }
 0xbc0   :  { %1860 = vrcp.f32 %v718_v57 }
 0xbcd   :  { %v1861_v58 = vpop.eup %1860 }
 0xbce   :  { %v725_v63 = vmul.f32 %v1861_v58, %v723_v62 }
 0xc2e   :  { %v728_v60 = vpop.permute.xlu1 %727 }
 0xc2f   :  { %v730_v61 = vmul.f32 %v1861_v58, %v728_v60 }
 0xc31   :  { %732 = vrot.lane.b32.xlu0 %v730_v61, %s1957_s9 }
 0xca3   :  { %v733_v1 = vpop.permute.xlu0 %732 }
 0xca4   :  { %v735_v3 = vadd.f32 %v733_v1, %v725_v63  ;;  %v2198_v63 = vshrl.u32 %v125_v9, 7 }
 0xca6   :  { %1862 = vtanh.f32 %v735_v3  ;;  %vm252_vm4 = vcmp.eq.s32.totalorder %v2198_v63, 7  ;;  %vm2626_vm8 = vcmp.eq.s32.totalorder %v2198_v63, 1  ;;  %vm375_vm9 = vcmp.eq.s32.totalorder %v2198_v63, 6 }
 0xca7   :  { %vm2279_vm7 = vmand %vm2262_vm3, %vm252_vm4  ;;  %vm2627_vm11 = vcmp.eq.s32.totalorder %v2198_v63, 2  ;;  %vm2628_vm13 = vcmp.eq.s32.totalorder %v2198_v63, 5  ;;  %vm2629_vm15 = vcmp.eq.s32.totalorder %v2198_v63, 3 }
 0xca8   :  { %vm2294_vm12 = vmand %vm127_vm5, %vm2626_vm8 }
 0xca9   :  { %vm2303_vm14 = vmand %vm2262_vm3, %vm375_vm9 }
 0xcaa   :  { %vm2312_vm1 = vmand %vm127_vm5, %vm2627_vm11 }
 0xcab   :  { %vm2329_vm8 = vmand %vm127_vm5, %vm2629_vm15 }
 0xcac   :  { %vm2347_vm10 = vmand %vm127_vm5, %vm375_vm9 }
 0xcb3   :  { %v1863_v20 = vpop.eup %1862 }
 0xcb4   :  { %738 = vrot.lane.b32.xlu1 %v1863_v20, %s1957_s9  ;;  %v2201_v20 = vsub.s32 0, %v2198_v63 }
 0xd26   :  { %v739_v5 = vpop.permute.xlu1 %738 }
 0xd27   :  { %v2164_v8 = vmul.f32 %v1861_v58, %v739_v5 }
 0xd29   :  { %v755_v11 = vrot.slane %v2164_v8, 4 }
 0xd2b   :  { %756 = vrot.lane.b32.xlu0 %v755_v11, %s1958_s1  ;;  %v2207_v11 = vsub.s32 2, %v2198_v63 }
 0xd2d   :  { %v505_v9 = vrot.slane %v2126_v26, %v2207_v11 }
 0xd9d   :  { %v757_v12 = vpop.permute.xlu0 %756 }
 0xd9e   :  { %1780 = vmatmul.mubr.msk.f32.vlgmr.msra.gmra.mxu0 %vm2624_vm2, %v757_v12  ;;  %v2213_v12 = vsub.s32 4, %v2198_v63 }
 0xd9f   :  { %1794 = vmatpush3.msra.mxu0 %v2003_v2  ;;  %1801 = vmatprep.mubr.msk.f32.mxu0 %vm1956_vm0, %v1955_v0 }
 0xda0   :  { %1795 = vmatprep.subr.mxu0 %v1955_v0 }
 0xda1   :  { %1796 = vmatpush3.msra.mxu0 %v2012_v4 }
 0xda2   :  { %1797 = vmatprep.subr.mxu0 %v1955_v0 }
 0xda3   :  { %1798 = vmatpush3.msra.mxu0 %v2019_v6 }
 0xda4   :  { %1799 = vmatprep.subr.mxu0 %v1955_v0 }
 0xda5   :  { %1800 = vmatpush3.msra.mxu0 %v2026_v7  ;;  %v842_v7 = vrot.slane %v735_v3, 7 }
 0xe5e   :  { %v826_v13 = vpop.f32.mrf.mxu0 }
 0xe5f   :  { %v831_v14 = vrot.slane %v826_v13, 3  ;;  %v748_v13 = vrot.slane %v2164_v8, %v2213_v12  ;;  %v42_v8 = vld [vmem:[%s2621_s2 + $0x18] sm:$0xff] }
 0xe60   :  { %v1781_v15 = vpop.f32.mrf.mxu0 }
 0xe61   :  { %v833_v2 = vadd.f32 %v831_v14, %v2074_v21  ;;  %v985_v14 = vsub.s32 6, %v2198_v63 }
 0xe63   :  { %1864 = vtanh.f32 %v833_v2  ;;  %v1654_v17 = vmul.f32 -1.442695, %v833_v2 }
 0xe65   :  { %1866 = vpow2.f32 %v1654_v17  ;;  %v2224_v17 = vsub.s32 1, %v2198_v63 }
 0xe70   :  { %v1865_v16 = vpop.eup %1864 }
 0xe71   :  { %846 = vrot.lane.b32.xlu1 %v1865_v16, %s1957_s9 }
 0xe72   :  { %v1867_v4 = vpop.eup %1866 }
 0xe73   :  { %v837_v18 = vadd.f32 1.0, %v1867_v4 }
 0xe75   :  { %1868 = vrcp.f32 %v837_v18  ;;  %v41_v18 = vld [vmem:[%s2621_s2 + $0x10] sm:$0xff] }
 0xe82   :  { %v1869_v19 = vpop.eup %1868 }
 0xe83   :  { %v844_v25 = vmul.f32 %v1869_v19, %v842_v7 }
 0xee3   :  { %v847_v6 = vpop.permute.xlu1 %846 }
 0xee4   :  { %v849_v24 = vmul.f32 %v1869_v19, %v847_v6  ;;  %v381_v6 = vrot.slane %v2107_v59, %v2224_v17 }
 0xee6   :  { %851 = vrot.lane.b32.xlu0 %v849_v24, %s1957_s9  ;;  %v2240_v24 = vsub.s32 3, %v2198_v63 }
 0xee8   :  { %v629_v7 = vrot.slane %v2145_v47, %v2240_v24 }
 0xf58   :  { %v852_v27 = vpop.permute.xlu0 %851 }
 0xf59   :  { %v854_v28 = vadd.f32 %v852_v27, %v844_v25  ;;  %v2248_v25 = vsub.s32 5, %v2198_v63  ;;  %v39_v27 = vld [vmem:[%s2621_s2] sm:$0xff] }
 0xf5b   :  { %1870 = vtanh.f32 %v854_v28  ;;  %v961_v45 = vrot.slane %v854_v28, 7 }
 0xf68   :  { %v1871_v21 = vpop.eup %1870 }
 0xf69   :  { %857 = vrot.lane.b32.xlu1 %v1871_v21, %s1957_s9 }
 0xfdb   :  { %v858_v29 = vpop.permute.xlu1 %857 }
 0xfdc   :  { %v2182_v30 = vmul.f32 %v1869_v19, %v858_v29  ;;  %v40_v19 = vld [vmem:[%s2621_s2 + $0x8] sm:$0xff]  ;;  %v2632_v29 = vmov 0 }
 0xfdd   :  { %v2633_v29 = vsel %vm2262_vm3, 4294967295, %v2632_v29 }
 0xfde   :  { %v874_v31 = vrot.slane %v2182_v30, 5  ;;  %v867_v59 = vrot.slane %v2182_v30, %v2248_v25 }
 0xfe0   :  { %875 = vrot.lane.b32.xlu0 %v874_v31, %s1958_s1 }
0x1052   :  { %v876_v32 = vpop.permute.xlu0 %875 }
0x1053   :  { %1791 = vmatmul.mubr.msk.f32.vlgmr.msra.gmra.mxu1 %vm2624_vm2, %v876_v32 }
0x1054   :  { %1812 = vmatprep.mubr.msk.f32.mxu1 %vm1956_vm0, %v1955_v0  ;;  %1805 = vmatpush3.msra.mxu1 %v42_v8  ;;  %vm2625_vm0 = vcmp.eq.s32.totalorder %v2198_v63, 0 }
0x1055   :  { %1806 = vmatprep.subr.mxu1 %v1955_v0  ;;  %vm2271_vm6 = vmand %vm127_vm5, %vm2625_vm0 }
0x1056   :  { %1807 = vmatpush3.msra.mxu1 %v41_v18  ;;  %vm2321_vm0 = vmand %vm2262_vm3, %vm2628_vm13 }
0x1057   :  { %1808 = vmatprep.subr.mxu1 %v1955_v0  ;;  %vm377_vm13 = vmor %vm2294_vm12, %vm2303_vm14  ;;  %vm2656_vm14 = vnez %v2633_v29 }
0x1058   :  { %1809 = vmatpush3.msra.mxu1 %v40_v19  ;;  %vm501_vm15 = vmor %vm2312_vm1, %vm2321_vm0 }
0x1059   :  { %1810 = vmatprep.subr.mxu1 %v1955_v0  ;;  %v1104_v0 = vsub.s32 7, %v2198_v63  ;;  %vm2654_vm12 = vmor %vm2271_vm6, %vm2279_vm7  ;;  %vm2659_vm7 = vcmp.eq.s32.totalorder %v2198_v63, 1 }
0x105a   :  { %1811 = vmatpush3.msra.mxu1 %v39_v27 }
0x1113   :  { %v945_v33 = vpop.f32.mrf.mxu1 }
0x1114   :  { %v950_v34 = vrot.slane %v945_v33, 2 }
0x1115   :  { %v1792_v35 = vpop.f32.mrf.mxu1 }
0x1116   :  { %v952_v36 = vadd.f32 %v950_v34, %v2076_v22 }
0x1118   :  { %1872 = vtanh.f32 %v952_v36  ;;  %v1656_v38 = vmul.f32 -1.442695, %v952_v36 }
0x111a   :  { %1874 = vpow2.f32 %v1656_v38 }
0x1125   :  { %v1873_v37 = vpop.eup %1872 }
0x1126   :  { %965 = vrot.lane.b32.xlu1 %v1873_v37, %s1957_s9 }
0x1127   :  { %v1875_v39 = vpop.eup %1874 }
0x1128   :  { %v956_v41 = vadd.f32 1.0, %v1875_v39 }
0x112a   :  { %1876 = vrcp.f32 %v956_v41 }
0x1137   :  { %v1877_v42 = vpop.eup %1876 }
0x1138   :  { %v963_v46 = vmul.f32 %v1877_v42, %v961_v45 }
0x1198   :  { %v966_v43 = vpop.permute.xlu1 %965 }
0x1199   :  { %v968_v44 = vmul.f32 %v1877_v42, %v966_v43 }
0x119b   :  { %970 = vrot.lane.b32.xlu0 %v968_v44, %s1957_s9 }
0x120d   :  { %v971_v48 = vpop.permute.xlu0 %970 }
0x120e   :  { %v973_v49 = vadd.f32 %v971_v48, %v963_v46 }
0x1210   :  { %1878 = vtanh.f32 %v973_v49  ;;  %v1080_v15 = vrot.slane %v973_v49, 7 }
0x121d   :  { %v1879_v22 = vpop.eup %1878 }
0x121e   :  { %976 = vrot.lane.b32.xlu1 %v1879_v22, %s1957_s9 }
0x1290   :  { %v977_v50 = vpop.permute.xlu1 %976 }
0x1291   :  { %v979_v51 = vmul.f32 %v1877_v42, %v977_v50  ;;  %v2652_v42 = vmov 0 }
0x1293   :  { %v993_v52 = vrot.slane %v979_v51, 6 }
0x1295   :  { %994 = vrot.lane.b32.xlu0 %v993_v52, %s1958_s1 }
0x1307   :  { %v995_v53 = vpop.permute.xlu0 %994 }
0x1308   :  { %1802 = vmatmul.mubr.msk.f32.vlgmr.msra.gmra.mxu0 %vm2624_vm2, %v995_v53  ;;  %vm623_vm2 = vcmp.eq.s32.totalorder %v2198_v63, 4 }
0x1309   :  { %vm2335_vm11 = vmand %vm2262_vm3, %vm623_vm2 }
0x130a   :  { %vm2359_vm3 = vmand %vm127_vm5, %vm252_vm4  ;;  %vm2655_vm4 = vcmp.eq.s32.totalorder %v2198_v63, 3 }
0x130b   :  { %v2653_v42 = vsel %vm2359_vm3, 4294967295, %v2652_v42  ;;  %vm625_vm9 = vmor %vm2329_vm8, %vm2335_vm11  ;;  %vm2657_vm3 = vcmp.eq.s32.totalorder %v2198_v63, 5  ;;  %vm2658_vm11 = vcmp.eq.s32.totalorder %v2198_v63, 2 }
0x130c   :  { %vm742_vm0 = vmand %vm127_vm5, %vm623_vm2 }
0x130d   :  { %vm743_vm1 = vmand %vm2656_vm14, %vm2655_vm4  ;;  %vm2660_vm4 = vcmp.eq.s32.totalorder %v2198_v63, 0 }
0x130e   :  { %vm861_vm8 = vmand %vm127_vm5, %vm2657_vm3 }
0x130f   :  { %vm862_vm6 = vmand %vm2656_vm14, %vm2658_vm11  ;;  %vm2661_vm11 = vnez %v2653_v42 }
0x1310   :  { %vm981_vm2 = vmand %vm2656_vm14, %vm2659_vm7 }
0x1311   :  { %vm1100_vm5 = vmand %vm2656_vm14, %vm2660_vm4 }
0x1312   :  { %vm982_vm3 = vmor %vm2347_vm10, %vm981_vm2  ;;  %vm1194_vm10 = vcmask 36864  }
0x1313   :  { %vm1101_vm7 = vmor %vm2661_vm11, %vm1100_vm5 }
0x13c8   :  { %v1064_v54 = vpop.f32.mrf.mxu0 }
0x13c9   :  { %v1069_v55 = vrot.slane %v1064_v54, 1 }
0x13ca   :  { %v1803_v56 = vpop.f32.mrf.mxu0 }
0x13cb   :  { %v1071_v57 = vadd.f32 %v1069_v55, %v2078_v23  ;;  %v258_v23 = vrot.slane %v2088_v40, %v2201_v20  ;;  %v986_v40 = vrot.slane %v979_v51, %v985_v14 }
0x13cd   :  { %1880 = vtanh.f32 %v1071_v57  ;;  %v1658_v60 = vmul.f32 -1.442695, %v1071_v57  ;;  %v2403_v57 = vld [vmem:[%s2621_s2 + $0x21] sm:$0x1f] }
0x13cf   :  { %1882 = vpow2.f32 %v1658_v60 }
0x13da   :  { %v1881_v58 = vpop.eup %1880 }
0x13db   :  { %1084 = vrot.lane.b32.xlu1 %v1881_v58, %s1957_s9  ;;  %v1960_v58 = vmov -10000.0  }
0x13dc   :  { %v1883_v61 = vpop.eup %1882 }
0x13dd   :  { %v1075_v62 = vadd.f32 1.0, %v1883_v61 }
0x13df   :  { %1884 = vrcp.f32 %v1075_v62 }
0x13ec   :  { %v1885_v1 = vpop.eup %1884 }
0x13ed   :  { %v1082_v2 = vmul.f32 %v1885_v1, %v1080_v15 }
0x144d   :  { %v1085_v3 = vpop.permute.xlu1 %1084 }
0x144e   :  { %v1087_v5 = vmul.f32 %v1885_v1, %v1085_v3 }
0x1450   :  { %1089 = vrot.lane.b32.xlu0 %v1087_v5, %s1957_s9 }
0x1454   :  { %260 = vrot.lane.b32.xlu0 %v258_v23, %s1958_s1 }
0x1458   :  { %507 = vrot.lane.b32.xlu0 %v505_v9, %s1958_s1 }
0x145c   :  { %750 = vrot.lane.b32.xlu0 %v748_v13, %s1958_s1 }
0x1460   :  { %988 = vrot.lane.b32.xlu0 %v986_v40, %s1958_s1 }
0x14c2   :  { %v1090_v26 = vpop.permute.xlu0 %1089 }
0x14c3   :  { %v1092_v16 = vadd.f32 %v1090_v26, %v1082_v2 }
0x14c5   :  { %1886 = vtanh.f32 %v1092_v16 }
0x14c6   :  { %v261_v34 = vpop.permute.xlu0 %260 }
0x14c7   :  { %v263_v44 = vsel %vm2654_vm12, %v261_v34, 0.0  ;;  %vm863_vm12 = vmor %vm861_vm8, %vm862_vm6  ;;  %vm2665_vm6 = vcmp.eq.s32.totalorder %v2198_v63, 3 }
0x14ca   :  { %v508_v43 = vpop.permute.xlu0 %507 }
0x14ce   :  { %v751_v49 = vpop.permute.xlu0 %750 }
0x14d2   :  { %v1887_v4 = vpop.eup %1886  ;;  %v989_v53 = vpop.permute.xlu0 %988 }
0x14d3   :  { %1095 = vrot.lane.b32.xlu1 %v1887_v4, %s1957_s9 }
0x14d7   :  { %383 = vrot.lane.b32.xlu1 %v381_v6, %s1958_s1 }
0x14db   :  { %631 = vrot.lane.b32.xlu1 %v629_v7, %s1958_s1 }
0x14df   :  { %869 = vrot.lane.b32.xlu1 %v867_v59, %s1958_s1 }
0x1545   :  { %v1096_v28 = vpop.permute.xlu1 %1095 }
0x1546   :  { %v1098_v21 = vmul.f32 %v1885_v1, %v1096_v28  ;;  %v1659_v1 = vld [vmem:[%s2621_s2 + $0x20] ss:$0 sm:$0xff] }
0x1548   :  { %v1105_v47 = vrot.slane %v1098_v21, %v1104_v0  ;;  %v2445_v0 = vld [vmem:[%s2621_s2 + $0x26] sm:$0x1f]  ;;  %s1961_s2 = smov [#allocation5]  }
0x1549   :  { %v384_v36 = vpop.permute.xlu1 %383  ;;  %s1618_s25 = sshll.u32 %s1961_s2, 4  ;;  %s1619_s25 = int_to_ptr.vmem [resolvable:$true] %s1618_s25 }
0x154a   :  { %1107 = vrot.lane.b32.xlu1 %v1105_v47, %s1958_s1  ;;  %v386_v46 = vsel %vm377_vm13, %v384_v36, %v263_v44  ;;  %vm744_vm13 = vmor %vm742_vm0, %vm743_vm1  ;;  %vm2417_vm0 = vcmp.eq.s32.totalorder %v2198_v63, %v2058_v10  ;;  %s1908_s26 = scalar_lea.vmem %s1619_s25, 16  ;;  %s1912_s27 = scalar_lea.vmem %s1619_s25, 32 }
0x154b   :  { %v510_v48 = vsel %vm501_vm15, %v508_v43, %v386_v46  ;;  %vm2662_vm15 = vcmask 261120   ;;  %p1909_p5 = scmp.ne.s32.totalorder %s1619_s25, %s1908_s26  ;;  %p1913_p6 = scmp.lt.s32.totalorder %s1619_s25, %s1619_s25 }
0x154c   :  { %p1914_p7 = scmp.lt.s32.totalorder %s1912_s27, %s1908_s26 }
0x154d   :  { %v632_v45 = vpop.permute.xlu1 %631 }
0x154e   :  { %v634_v22 = vsel %vm625_vm9, %v632_v45, %v510_v48  ;;  %vm1246_vm9 = vcmp.eq.s32.totalorder %v2058_v10, 3  ;;  %p1915_p8 = por %p1914_p7, %p1913_p6 }
0x154f   :  { %v753_v51 = vsel %vm744_vm13, %v751_v49, %v634_v22  ;;  %v1247_v60 = vsel %vm1246_vm9, 0.0, %v1960_v58  ;;  %vm1467_vm13 = vcmask 39943  }
0x1550   :  { %v1257_v61 = vadd.f32 %v1247_v60, %v2403_v57  ;;  %p1916_p9 = pnand %p1915_p8, %p1909_p5 }
0x1551   :  { %v870_v50 = vpop.permute.xlu1 %869 }
0x1552   :  { %v872_v52 = vsel %vm863_vm12, %v870_v50, %v753_v51  ;;  %v1258_v62 = vsel %vm1194_vm10, %v1257_v61, -inf  ;;  %vm1488_vm12 = vcmask 7175  }
0x1553   :  { %v991_v54 = vsel %vm982_vm3, %v989_v53, %v872_v52 }
0x156e   :  { %1259 = vmax.xlane.f32.xlu1 %v1258_v62 }
0x15bc   :  { %v1108_v55 = vpop.permute.xlu1 %1107 }
0x15bd   :  { %v1110_v56 = vsel %vm1101_vm7, %v1108_v55, %v991_v54 }
0x15be   :  { %1813 = vmatmul.mubr.msk.f32.vlgmr.msra.gmra.mxu1 %vm2662_vm15, %v1110_v56 }
0x15f7   :  { %v1260_v7 = vpop.xlane.xlu1 %1259 }
0x167e   :  { %v1184_v3 = vpop.f32.mrf.mxu1 }
0x167f   :  { %v2413_v5 = vadd.f32 %v1659_v1, %v1184_v3 }
0x1680   :  { %v1814_v23 = vpop.f32.mrf.mxu1 }
0x1681   :  { %v1225_v13 = vrot.slane %v2413_v5, %v2213_v12  ;;  %v1192_v40 = vrot.slane %v2413_v5, %v2201_v20  ;;  %v1241_v15 = vrot.slane %v2413_v5, %v985_v14  ;;  %v1209_v2 = vrot.slane %v2413_v5, %v2207_v11 }
0x1683   :  { %v1226_v26 = vsel %vm2417_vm0, %v1225_v13, 0.0  ;;  %v1193_v16 = vsel %vm2417_vm0, %v1192_v40, 0.0  ;;  %v1242_v18 = vsel %vm2417_vm0, %v1241_v15, 0.0  ;;  %v1210_v14 = vsel %vm2417_vm0, %v1209_v2, 0.0 }
0x1684   :  { %v1227_v4 = vsel %vm1194_vm10, %v1226_v26, 0.0  ;;  %v1195_v8 = vsel %vm1194_vm10, %v1193_v16, 0.0  ;;  %v1243_v19 = vsel %vm1194_vm10, %v1242_v18, 0.0  ;;  %v1211_v6 = vsel %vm1194_vm10, %v1210_v14, 0.0 }
0x1685   :  { %1228 = vadd.xlane.f32.xlu1 %v1227_v4  ;;  %1196 = vadd.xlane.f32.xlu0 %v1195_v8  ;;  %v1201_v26 = vrot.slane %v2413_v5, %v2224_v17  ;;  %v1248_v14 = vsel %vm2665_vm6, 0.0, %v1960_v58 }
0x1687   :  { %v1202_v8 = vsel %vm2417_vm0, %v1201_v26, 0.0 }
0x1688   :  { %v1203_v18 = vsel %vm1194_vm10, %v1202_v8, 0.0 }
0x1689   :  { %1244 = vadd.xlane.f32.xlu1 %v1243_v19  ;;  %1212 = vadd.xlane.f32.xlu0 %v1211_v6  ;;  %v1249_v19 = vadd.f32 %v1248_v14, %v2445_v0  ;;  %v1233_v14 = vrot.slane %v2413_v5, %v2248_v25 }
0x168b   :  { %v1250_v6 = vsel %vm1194_vm10, %v1249_v19, -inf }
0x170e   :  { %v1197_v59 = vpop.xlane.xlu0 %1196  ;;  %v1229_v54 = vpop.xlane.xlu1 %1228 }
0x170f   :  { %v1262_v27 = vadd.f32 %v1260_v7, %v1197_v59 }
0x1711   :  { %v2448_v28 = vadd.f32 %v1262_v27, %v2445_v0 }
0x1712   :  { %v1213_v38 = vpop.xlane.xlu0 %1212  ;;  %v1245_v27 = vpop.xlane.xlu1 %1244 }
0x1713   :  { %v1264_v21 = vsel %vm1194_vm10, %v2448_v28, -inf }
0x1714   :  { %v1265_v47 = vrot.slane %v1264_v21, 4 }
0x1716   :  { %v1266_v29 = vmax.f32 %v1264_v21, %v1265_v47 }
0x1718   :  { %v1267_v30 = vrot.slane %v1266_v29, 2 }
0x171a   :  { %v1268_v31 = vmax.f32 %v1266_v29, %v1267_v30 }
0x171c   :  { %v1269_v32 = vrot.slane %v1268_v31, 1 }
0x171e   :  { %v2452_v33 = vmax.f32 %v1268_v31, %v1269_v32 }
0x1720   :  { %vm1271_vm14 = vcmp.eq.f32.partialorder %v2448_v28, %v2452_v33  ;;  %v1291_v34 = vadd.f32 %v2452_v33, %v2413_v5 }
0x1722   :  { %v1316_v35 = vrot.slane %v1291_v34, %v2224_v17  ;;  %v1251_v17 = vrot.slane %v1250_v6, 4 }
0x1724   :  { %v1317_v36 = vadd.f32 %v1316_v35, %v2403_v57  ;;  %v1252_v7 = vmax.f32 %v1250_v6, %v1251_v17  ;;  %v1234_v17 = vsel %vm2417_vm0, %v1233_v14, 0.0 }
0x1726   :  { %v1318_v37 = vsel %vm1194_vm10, %v1317_v36, -inf  ;;  %v1253_v59 = vrot.slane %v1252_v7, 2 }
0x1727   :  { %1319 = vmax.xlane.f32.xlu0 %v1318_v37 }
0x1728   :  { %v1254_v29 = vmax.f32 %v1252_v7, %v1253_v59  ;;  %v1235_v7 = vsel %vm1194_vm10, %v1234_v17, 0.0 }
0x172a   :  { %v1255_v34 = vrot.slane %v1254_v29, 1 }
0x172c   :  { %v1256_v36 = vmax.f32 %v1254_v29, %v1255_v34 }
0x17b0   :  { %v1320_v39 = vpop.xlane.xlu0 %1319 }
0x17b1   :  { %v1322_v41 = vadd.f32 %v1320_v39, %v1213_v38  ;;  %v1261_v39 = vadd.f32 %v1256_v36, %v2413_v5 }
0x17b3   :  { %v2462_v42 = vadd.f32 %v1322_v41, %v2445_v0 }
0x17b5   :  { %v1324_v43 = vsel %vm1194_vm10, %v2462_v42, -inf }
0x17b6   :  { %v1325_v44 = vrot.slane %v1324_v43, 4 }
0x17b8   :  { %v1326_v45 = vmax.f32 %v1324_v43, %v1325_v44  ;;  %v1464_v43 = vrot.slane %v2403_v57, 5 }
0x17ba   :  { %v1327_v46 = vrot.slane %v1326_v45, 2 }
0x17bc   :  { %v1328_v48 = vmax.f32 %v1326_v45, %v1327_v46  ;;  %v1286_v45 = vrot.slane %v1261_v39, %v2201_v20 }
0x17be   :  { %v1329_v49 = vrot.slane %v1328_v48, 1 }
0x17c0   :  { %v2466_v22 = vmax.f32 %v1328_v48, %v1329_v49  ;;  %v1287_v49 = vadd.f32 %v1286_v45, %v2403_v57 }
0x17c2   :  { %vm1331_vm1 = vcmp.eq.f32.partialorder %v2462_v42, %v2466_v22  ;;  %v1351_v50 = vadd.f32 %v2466_v22, %v2413_v5 }
0x17c4   :  { %v1376_v51 = vrot.slane %v1351_v50, %v2240_v24  ;;  %v1217_v50 = vrot.slane %v2413_v5, %v2240_v24 }
0x17c6   :  { %v1377_v52 = vadd.f32 %v1376_v51, %v2403_v57  ;;  %v1288_v51 = vsel %vm1194_vm10, %v1287_v49, -inf }
0x17c8   :  { %v1378_v53 = vsel %vm1194_vm10, %v1377_v52, -inf  ;;  %v1218_v52 = vsel %vm2417_vm0, %v1217_v50, 0.0 }
0x17c9   :  { %1379 = vmax.xlane.f32.xlu0 %v1378_v53  ;;  %v1219_v53 = vsel %vm1194_vm10, %v1218_v52, 0.0 }
0x1852   :  { %v1380_v55 = vpop.xlane.xlu0 %1379 }
0x1853   :  { %v1382_v56 = vadd.f32 %v1380_v55, %v1229_v54 }
0x1855   :  { %v2476_v60 = vadd.f32 %v1382_v56, %v2445_v0 }
0x1857   :  { %v1384_v61 = vsel %vm1194_vm10, %v2476_v60, -inf }
0x1858   :  { %v1385_v62 = vrot.slane %v1384_v61, 4 }
0x185a   :  { %v1386_v1 = vmax.f32 %v1384_v61, %v1385_v62 }
0x185c   :  { %v1387_v3 = vrot.slane %v1386_v1, 2 }
0x185e   :  { %v1388_v23 = vmax.f32 %v1386_v1, %v1387_v3 }
0x1860   :  { %v1389_v13 = vrot.slane %v1388_v23, 1 }
0x1862   :  { %v2480_v40 = vmax.f32 %v1388_v23, %v1389_v13 }
0x1864   :  { %vm1391_vm8 = vcmp.eq.f32.partialorder %v2476_v60, %v2480_v40  ;;  %v1411_v15 = vadd.f32 %v2480_v40, %v2413_v5 }
0x1866   :  { %v1436_v2 = vrot.slane %v1411_v15, %v2248_v25 }
0x1868   :  { %v1437_v16 = vadd.f32 %v1436_v2, %v2403_v57 }
0x186a   :  { %v1438_v4 = vsel %vm1194_vm10, %v1437_v16, -inf }
0x186b   :  { %1439 = vmax.xlane.f32.xlu0 %v1438_v4 }
0x186f   :  { %1204 = vadd.xlane.f32.xlu0 %v1203_v18 }
0x18f4   :  { %v1440_v21 = vpop.xlane.xlu0 %1439 }
0x18f5   :  { %v1441_v47 = vadd.f32 %v1440_v21, %v1245_v27 }
0x18f7   :  { %v2500_v30 = vadd.f32 %v1441_v47, %v2445_v0 }
0x18f8   :  { %v1205_v56 = vpop.xlane.xlu0 %1204 }
0x18f9   :  { %v1443_v31 = vsel %vm1194_vm10, %v2500_v30, -inf }
0x18fa   :  { %v1444_v32 = vrot.slane %v1443_v31, 4 }
0x18fc   :  { %v1445_v58 = vmax.f32 %v1443_v31, %v1444_v32 }
0x18fe   :  { %v1446_v35 = vrot.slane %v1445_v58, 2 }
0x1900   :  { %v1447_v37 = vmax.f32 %v1445_v58, %v1446_v35 }
0x1902   :  { %v1448_v38 = vrot.slane %v1447_v37, 1 }
0x1904   :  { %v2505_v41 = vmax.f32 %v1447_v37, %v1448_v38 }
0x1906   :  { %vm1450_vm2 = vcmp.eq.f32.partialorder %v2500_v30, %v2505_v41  ;;  %v1462_v44 = vadd.f32 %v2505_v41, %v2413_v5 }
0x1907   :  { %v1451_v45 = vsel %vm1450_vm2, %v2198_v63, 5 }
0x1908   :  { %v1466_v46 = vadd.f32 %v1464_v43, %v1462_v44 }
0x190a   :  { %v1468_v48 = vsel %vm1467_vm13, %v1466_v46, -inf }
0x190b   :  { %1469 = vmax.xlane.f32.xlu1 %v1468_v48 }
0x190f   :  { %1289 = vmax.xlane.f32.xlu1 %v1288_v51 }
0x1913   :  { %1220 = vadd.xlane.f32.xlu1 %v1219_v53 }
0x1994   :  { %v1470_v20 = vpop.xlane.xlu1 %1469 }
0x1995   :  { %vm1471_vm4 = vcmp.eq.f32.partialorder %v1466_v46, %v1470_v20  ;;  %1489 = vst.msk [vmem:[#allocation5 - $0x7] sm:$0x80] %vm1488_vm12, %v1470_v20  ;;  %v1452_v46 = vsel %vm1194_vm10, %v1451_v45, 2147483647  ;;  %v1392_v45 = vsel %vm1391_vm8, %v2198_v63, 5 }
0x1996   :  { %v1472_v54 = vsel %vm1471_vm4, %v2058_v10, 5  ;;  %v1453_v48 = vrot.slane %v1452_v46, 4 }
0x1997   :  { %v1473_v55 = vsel %vm1467_vm13, %v1472_v54, 2147483647 }
0x1998   :  { %v1290_v61 = vpop.xlane.xlu1 %1289  ;;  %v1475_v24 = vshra.s32 %v1473_v55, 16  ;;  %v1474_v59 = vand.u32 65535, %v1473_v55  ;;  %vm1454_vm7 = vcmp.lt.s32.totalorder %v1452_v46, %v1453_v48 }
0x1999   :  { %v1292_v62 = vadd.f32 %v1290_v61, %v1205_v56  ;;  %v1455_v49 = vsel %vm1454_vm7, %v1452_v46, %v1453_v48  ;;  %vm1508_vm7 = vcmp.eq.s32.totalorder %v2058_v10, 6  ;;  %v1393_v46 = vsel %vm1194_vm10, %v1392_v45, 2147483647 }
0x199a   :  { %v1477_v1 = vcvt.s32.f32 %v1475_v24  ;;  %v1476_v21 = vcvt.s32.f32 %v1474_v59  ;;  %v1456_v50 = vrot.slane %v1455_v49, 2  ;;  %v1394_v48 = vrot.slane %v1393_v46, 4 }
0x199b   :  { %v2524_v3 = vadd.f32 %v1292_v62, %v2445_v0 }
0x199c   :  { %1478 = vmin.xlane.f32.xlu0 %v1477_v1  ;;  %vm1457_vm15 = vcmp.lt.s32.totalorder %v1455_v49, %v1456_v50 }
0x199d   :  { %v1294_v23 = vsel %vm1194_vm10, %v2524_v3, -inf }
0x199e   :  { %v1295_v13 = vrot.slane %v1294_v23, 4 }
0x19a0   :  { %v1296_v15 = vmax.f32 %v1294_v23, %v1295_v13 }
0x19a2   :  { %v1297_v2 = vrot.slane %v1296_v15, 2 }
0x19a4   :  { %v1298_v26 = vmax.f32 %v1296_v15, %v1297_v2 }
0x19a6   :  { %v1299_v16 = vrot.slane %v1298_v26, 1 }
0x19a8   :  { %v2528_v4 = vmax.f32 %v1298_v26, %v1299_v16 }
0x19aa   :  { %vm1301_vm5 = vcmp.eq.f32.partialorder %v2524_v3, %v2528_v4  ;;  %v1321_v8 = vadd.f32 %v2528_v4, %v2413_v5 }
0x19ac   :  { %v1346_v18 = vrot.slane %v1321_v8, %v2207_v11  ;;  %v1221_v11 = vpop.xlane.xlu1 %1220 }
0x19ae   :  { %v1347_v19 = vadd.f32 %v1346_v18, %v2403_v57 }
0x19b0   :  { %v1348_v6 = vsel %vm1194_vm10, %v1347_v19, -inf }
0x19b1   :  { %1349 = vmax.xlane.f32.xlu0 %v1348_v6 }
0x19b5   :  { %1236 = vadd.xlane.f32.xlu0 %v1235_v7 }
0x1a25   :  { %v1479_v27 = vpop.xlane.xlu0 %1478 }
0x1a26   :  { %vm1480_vm3 = vcmp.eq.f32.partialorder %v1477_v1, %v1479_v27  ;;  %v1485_v51 = vcvt.f32.s32 %v1479_v27 }
0x1a27   :  { %v1481_v47 = vsel %vm1480_vm3, %v1476_v21, inf  ;;  %vm1491_vm3 = vcmp.eq.s32.totalorder %v2058_v10, 7 }
0x1a28   :  { %1482 = vmin.xlane.f32.xlu1 %v1481_v47 }
0x1a3a   :  { %v1350_v29 = vpop.xlane.xlu0 %1349 }
0x1a3b   :  { %v1352_v25 = vadd.f32 %v1350_v29, %v1221_v11 }
0x1a3d   :  { %v2543_v31 = vadd.f32 %v1352_v25, %v2445_v0 }
0x1a3e   :  { %v1237_v1 = vpop.xlane.xlu0 %1236 }
0x1a3f   :  { %v1354_v32 = vsel %vm1194_vm10, %v2543_v31, -inf }
0x1a40   :  { %v1355_v9 = vrot.slane %v1354_v32, 4 }
0x1a42   :  { %v1356_v34 = vmax.f32 %v1354_v32, %v1355_v9 }
0x1a44   :  { %v1357_v58 = vrot.slane %v1356_v34, 2 }
0x1a46   :  { %v1358_v35 = vmax.f32 %v1356_v34, %v1357_v58 }
0x1a48   :  { %v1359_v36 = vrot.slane %v1358_v35, 1 }
0x1a4a   :  { %v2547_v37 = vmax.f32 %v1358_v35, %v1359_v36 }
0x1a4c   :  { %vm1361_vm11 = vcmp.eq.f32.partialorder %v2543_v31, %v2547_v37  ;;  %v1381_v38 = vadd.f32 %v2547_v37, %v2413_v5  ;;  %v1458_v5 = vsel %vm1457_vm15, %v1455_v49, %v1456_v50 }
0x1a4e   :  { %v1406_v39 = vrot.slane %v1381_v38, %v2213_v12  ;;  %v1459_v12 = vrot.slane %v1458_v5, 1 }
0x1a50   :  { %v1407_v43 = vadd.f32 %v1406_v39, %v2403_v57  ;;  %v1486_v57 = vshll.u32 %v1485_v51, 16  ;;  %vm1460_vm0 = vcmp.lt.s32.totalorder %v1458_v5, %v1459_v12 }
0x1a51   :  { %v1461_v54 = vsel %vm1460_vm0, %v1458_v5, %v1459_v12 }
0x1a52   :  { %v1408_v44 = vsel %vm1194_vm10, %v1407_v43, -inf }
0x1a53   :  { %1409 = vmax.xlane.f32.xlu1 %v1408_v44 }
0x1ab1   :  { %v1483_v52 = vpop.xlane.xlu1 %1482 }
0x1ab2   :  { %v1484_v53 = vcvt.f32.s32 %v1483_v52 }
0x1ab4   :  { %v1487_v20 = vadd.s32 %v1486_v57, %v1484_v53 }
0x1ab6   :  { %vm1490_vm6 = vcmp.eq.s32.totalorder %v2058_v10, %v1487_v20  ;;  %v1492_v9 = vsel %vm1491_vm3, %v1487_v20, 0 }
0x1ab7   :  { %v1493_v30 = vsel %vm1490_vm6, %v1461_v54, 0  ;;  %vm1395_vm6 = vcmp.lt.s32.totalorder %v1393_v46, %v1394_v48 }
0x1ab8   :  { %v1494_v41 = vsel %vm1467_vm13, %v1493_v30, 0  ;;  %v1396_v49 = vsel %vm1395_vm6, %v1393_v46, %v1394_v48 }
0x1ab9   :  { %v1496_v55 = vshrl.u32 %v1494_v41, 16  ;;  %v1495_v56 = vand.u32 65535, %v1494_v41  ;;  %v1397_v50 = vrot.slane %v1396_v49, 2 }
0x1abb   :  { %v1498_v61 = vcvt.s32.f32 %v1496_v55  ;;  %v1497_v24 = vcvt.s32.f32 %v1495_v56 }
0x1abd   :  { %1501 = vadd.xlane.f32.xlu0 %v1498_v61  ;;  %1499 = vadd.xlane.f32.xlu1 %v1497_v24 }
0x1adc   :  { %v1410_v62 = vpop.xlane.xlu1 %1409 }
0x1add   :  { %v1412_v23 = vadd.f32 %v1410_v62, %v1237_v1  ;;  %v1362_v62 = vsel %vm1361_vm11, %v2198_v63, 5 }
0x1ade   :  { %v1363_v1 = vsel %vm1194_vm10, %v1362_v62, 2147483647 }
0x1adf   :  { %v1413_v13 = vadd.f32 %v1412_v23, %v2445_v0  ;;  %v1364_v23 = vrot.slane %v1363_v1, 4 }
0x1ae1   :  { %v1414_v15 = vsel %vm1194_vm10, %v1413_v13, -inf  ;;  %vm1365_vm3 = vcmp.lt.s32.totalorder %v1363_v1, %v1364_v23 }
0x1ae2   :  { %v1415_v2 = vrot.slane %v1414_v15, 4 }
0x1ae4   :  { %v1416_v26 = vmax.f32 %v1414_v15, %v1415_v2 }
0x1ae6   :  { %v1417_v16 = vrot.slane %v1416_v26, 2 }
0x1ae8   :  { %v1418_v8 = vmax.f32 %v1416_v26, %v1417_v16 }
0x1aea   :  { %v1419_v18 = vrot.slane %v1418_v8, 1 }
0x1aec   :  { %v1420_v14 = vmax.f32 %v1418_v8, %v1419_v18 }
0x1aee   :  { %vm1421_vm2 = vcmp.eq.f32.partialorder %v1413_v13, %v1420_v14  ;;  %v1366_v13 = vsel %vm1365_vm3, %v1363_v1, %v1364_v23 }
0x1aef   :  { %v1422_v19 = vsel %vm1421_vm2, %v2198_v63, 5  ;;  %vm1398_vm2 = vcmp.lt.s32.totalorder %v1396_v49, %v1397_v50  ;;  %v1367_v15 = vrot.slane %v1366_v13, 2 }
0x1af0   :  { %v1423_v6 = vsel %vm1194_vm10, %v1422_v19, 2147483647  ;;  %v1399_v5 = vsel %vm1398_vm2, %v1396_v49, %v1397_v50 }
0x1af1   :  { %v1424_v17 = vrot.slane %v1423_v6, 4  ;;  %v1400_v52 = vrot.slane %v1399_v5, 1 }
0x1af3   :  { %vm1425_vm12 = vcmp.lt.s32.totalorder %v1423_v6, %v1424_v17 }
0x1af4   :  { %v1426_v7 = vsel %vm1425_vm12, %v1423_v6, %v1424_v17  ;;  %vm1525_vm12 = vcmp.eq.s32.totalorder %v2058_v10, 5 }
0x1af5   :  { %v1427_v59 = vrot.slane %v1426_v7, 2 }
0x1af7   :  { %vm1428_vm4 = vcmp.lt.s32.totalorder %v1426_v7, %v1427_v59 }
0x1af8   :  { %v1429_v27 = vsel %vm1428_vm4, %v1426_v7, %v1427_v59  ;;  %vm1401_vm4 = vcmp.lt.s32.totalorder %v1399_v5, %v1400_v52 }
0x1af9   :  { %v1430_v47 = vrot.slane %v1429_v27, 1  ;;  %v1402_v40 = vsel %vm1401_vm4, %v1399_v5, %v1400_v52  ;;  %v1302_v5 = vsel %vm1301_vm5, %v2198_v63, 5 }
0x1afb   :  { %vm1431_vm15 = vcmp.lt.s32.totalorder %v1429_v27, %v1430_v47 }
0x1afc   :  { %v1432_v58 = vsel %vm1431_vm15, %v1429_v27, %v1430_v47  ;;  %vm1542_vm15 = vcmp.eq.s32.totalorder %v2058_v10, 4  ;;  %v1332_v47 = vsel %vm1331_vm1, %v2198_v63, 5 }
0x1b46   :  { %v1502_v0 = vpop.xlane.xlu0 %1501  ;;  %v1500_v21 = vpop.xlane.xlu1 %1499 }
0x1b47   :  { %v1504_v11 = vcvt.f32.s32 %v1502_v0  ;;  %v1503_v25 = vcvt.f32.s32 %v1500_v21 }
0x1b49   :  { %v1505_v29 = vshll.u32 %v1504_v11, 16  ;;  %v1333_v11 = vsel %vm1194_vm10, %v1332_v47, 2147483647 }
0x1b4b   :  { %v1506_v32 = vadd.s32 %v1505_v29, %v1503_v25  ;;  %v1334_v29 = vrot.slane %v1333_v11, 4 }
0x1b4d   :  { %vm1507_vm0 = vcmp.eq.s32.totalorder %v2058_v10, %v1506_v32  ;;  %v1509_v34 = vsel %vm1508_vm7, %v1506_v32, %v1492_v9  ;;  %vm1368_vm7 = vcmp.lt.s32.totalorder %v1366_v13, %v1367_v15  ;;  %vm1335_vm6 = vcmp.lt.s32.totalorder %v1333_v11, %v1334_v29 }
0x1b4e   :  { %v1510_v35 = vsel %vm1507_vm0, %v1432_v58, 0  ;;  %v1369_v2 = vsel %vm1368_vm7, %v1366_v13, %v1367_v15  ;;  %v1336_v25 = vsel %vm1335_vm6, %v1333_v11, %v1334_v29  ;;  %v1272_v13 = vsel %vm1271_vm14, %v2198_v63, 5 }
0x1b4f   :  { %v1511_v36 = vsel %vm1467_vm13, %v1510_v35, 0  ;;  %v1370_v8 = vrot.slane %v1369_v2, 1  ;;  %v1337_v32 = vrot.slane %v1336_v25, 2  ;;  %v1273_v15 = vsel %vm1194_vm10, %v1272_v13, 2147483647 }
0x1b50   :  { %v1513_v38 = vshrl.u32 %v1511_v36, 16  ;;  %v1512_v39 = vand.u32 65535, %v1511_v36 }
0x1b51   :  { %vm1371_vm0 = vcmp.lt.s32.totalorder %v1369_v2, %v1370_v8  ;;  %vm1338_vm2 = vcmp.lt.s32.totalorder %v1336_v25, %v1337_v32 }
0x1b52   :  { %v1515_v43 = vcvt.s32.f32 %v1513_v38  ;;  %v1514_v44 = vcvt.s32.f32 %v1512_v39  ;;  %v1372_v37 = vsel %vm1371_vm0, %v1369_v2, %v1370_v8  ;;  %v1339_v9 = vsel %vm1338_vm2, %v1336_v25, %v1337_v32 }
0x1b53   :  { %v1340_v35 = vrot.slane %v1339_v9, 1  ;;  %v1274_v2 = vrot.slane %v1273_v15, 4 }
0x1b54   :  { %1518 = vadd.xlane.f32.xlu0 %v1515_v43  ;;  %1516 = vadd.xlane.f32.xlu1 %v1514_v44 }
0x1b55   :  { %vm1275_vm7 = vcmp.lt.s32.totalorder %v1273_v15, %v1274_v2 }
0x1bdd   :  { %v1519_v51 = vpop.xlane.xlu0 %1518  ;;  %v1517_v12 = vpop.xlane.xlu1 %1516 }
0x1bde   :  { %v1521_v57 = vcvt.f32.s32 %v1519_v51  ;;  %v1520_v20 = vcvt.f32.s32 %v1517_v12  ;;  %v1303_v51 = vsel %vm1194_vm10, %v1302_v5, 2147483647 }
0x1bdf   :  { %v1304_v12 = vrot.slane %v1303_v51, 4 }
0x1be0   :  { %v1522_v53 = vshll.u32 %v1521_v57, 16 }
0x1be1   :  { %vm1305_vm1 = vcmp.lt.s32.totalorder %v1303_v51, %v1304_v12 }
0x1be2   :  { %v1523_v54 = vadd.s32 %v1522_v53, %v1520_v20  ;;  %v1306_v52 = vsel %vm1305_vm1, %v1303_v51, %v1304_v12 }
0x1be3   :  { %v1307_v57 = vrot.slane %v1306_v52, 2 }
0x1be4   :  { %vm1524_vm8 = vcmp.eq.s32.totalorder %v2058_v10, %v1523_v54  ;;  %v1526_v60 = vsel %vm1525_vm12, %v1523_v54, %v1509_v34  ;;  %vm1341_vm12 = vcmp.lt.s32.totalorder %v1339_v9, %v1340_v35 }
0x1be5   :  { %v1527_v30 = vsel %vm1524_vm8, %v1402_v40, 0  ;;  %v1342_v22 = vsel %vm1341_vm12, %v1339_v9, %v1340_v35  ;;  %vm1575_vm8 = vcmp.eq.s32.totalorder %v2058_v10, 2 }
0x1be6   :  { %v1528_v41 = vsel %vm1467_vm13, %v1527_v30, 0 }
0x1be7   :  { %v1530_v55 = vshrl.u32 %v1528_v41, 16  ;;  %v1529_v56 = vand.u32 65535, %v1528_v41 }
0x1be9   :  { %v1532_v61 = vcvt.s32.f32 %v1530_v55  ;;  %v1531_v24 = vcvt.s32.f32 %v1529_v56 }
0x1beb   :  { %1535 = vadd.xlane.f32.xlu0 %v1532_v61  ;;  %1533 = vadd.xlane.f32.xlu1 %v1531_v24 }
0x1c74   :  { %v1536_v26 = vpop.xlane.xlu0 %1535  ;;  %v1534_v16 = vpop.xlane.xlu1 %1533 }
0x1c75   :  { %v1538_v18 = vcvt.f32.s32 %v1536_v26  ;;  %v1537_v19 = vcvt.f32.s32 %v1534_v16  ;;  %v1276_v26 = vsel %vm1275_vm7, %v1273_v15, %v1274_v2 }
0x1c76   :  { %v1277_v16 = vrot.slane %v1276_v26, 2 }
0x1c77   :  { %v1539_v14 = vshll.u32 %v1538_v18, 16 }
0x1c79   :  { %v1540_v6 = vadd.s32 %v1539_v14, %v1537_v19 }
0x1c7b   :  { %vm1541_vm11 = vcmp.eq.s32.totalorder %v2058_v10, %v1540_v6  ;;  %v1543_v31 = vsel %vm1542_vm15, %v1540_v6, %v1526_v60  ;;  %vm1278_vm15 = vcmp.lt.s32.totalorder %v1276_v26, %v1277_v16 }
0x1c7c   :  { %v1544_v17 = vsel %vm1541_vm11, %v1372_v37, 0  ;;  %v1279_v8 = vsel %vm1278_vm15, %v1276_v26, %v1277_v16  ;;  %vm1592_vm11 = vcmp.eq.s32.totalorder %v2058_v10, 1 }
0x1c7d   :  { %v1545_v7 = vsel %vm1467_vm13, %v1544_v17, 0  ;;  %v1280_v19 = vrot.slane %v1279_v8, 1 }
0x1c7e   :  { %v1547_v59 = vshrl.u32 %v1545_v7, 16  ;;  %v1546_v27 = vand.u32 65535, %v1545_v7 }
0x1c7f   :  { %vm1281_vm0 = vcmp.lt.s32.totalorder %v1279_v8, %v1280_v19 }
0x1c80   :  { %v1549_v0 = vcvt.s32.f32 %v1547_v59  ;;  %v1548_v21 = vcvt.s32.f32 %v1546_v27  ;;  %v1282_v63 = vsel %vm1281_vm0, %v1279_v8, %v1280_v19 }
0x1c82   :  { %1552 = vadd.xlane.f32.xlu0 %v1549_v0  ;;  %1550 = vadd.xlane.f32.xlu1 %v1548_v21 }
0x1d0b   :  { %v1553_v34 = vpop.xlane.xlu0 %1552  ;;  %v1551_v58 = vpop.xlane.xlu1 %1550 }
0x1d0c   :  { %v1555_v36 = vcvt.f32.s32 %v1553_v34  ;;  %v1554_v39 = vcvt.f32.s32 %v1551_v58 }
0x1d0e   :  { %v1556_v38 = vshll.u32 %v1555_v36, 16 }
0x1d10   :  { %v1557_v43 = vadd.s32 %v1556_v38, %v1554_v39 }
0x1d12   :  { %vm1558_vm4 = vcmp.eq.s32.totalorder %v2058_v10, %v1557_v43  ;;  %v1559_v42 = vsel %vm1246_vm9, %v1557_v43, %v1543_v31  ;;  %vm1308_vm9 = vcmp.lt.s32.totalorder %v1306_v52, %v1307_v57 }
0x1d13   :  { %v1560_v44 = vsel %vm1558_vm4, %v1342_v22, 0  ;;  %v1309_v53 = vsel %vm1308_vm9, %v1306_v52, %v1307_v57 }
0x1d14   :  { %v1561_v45 = vsel %vm1467_vm13, %v1560_v44, 0  ;;  %v1310_v60 = vrot.slane %v1309_v53, 1 }
0x1d15   :  { %v1563_v46 = vshrl.u32 %v1561_v45, 16  ;;  %v1562_v48 = vand.u32 65535, %v1561_v45 }
0x1d16   :  { %vm1311_vm3 = vcmp.lt.s32.totalorder %v1309_v53, %v1310_v60 }
0x1d17   :  { %v1565_v49 = vcvt.s32.f32 %v1563_v46  ;;  %v1564_v50 = vcvt.s32.f32 %v1562_v48  ;;  %v1312_v4 = vsel %vm1311_vm3, %v1309_v53, %v1310_v60 }
0x1d19   :  { %1568 = vadd.xlane.f32.xlu0 %v1565_v49  ;;  %1566 = vadd.xlane.f32.xlu1 %v1564_v50 }
0x1da2   :  { %v1569_v20 = vpop.xlane.xlu0 %1568  ;;  %v1567_v54 = vpop.xlane.xlu1 %1566 }
0x1da3   :  { %v1571_v40 = vcvt.f32.s32 %v1569_v20  ;;  %v1570_v41 = vcvt.f32.s32 %v1567_v54 }
0x1da5   :  { %v1572_v30 = vshll.u32 %v1571_v40, 16 }
0x1da7   :  { %v1573_v55 = vadd.s32 %v1572_v30, %v1570_v41 }
0x1da9   :  { %vm1574_vm5 = vcmp.eq.s32.totalorder %v2058_v10, %v1573_v55  ;;  %v1576_v3 = vsel %vm1575_vm8, %v1573_v55, %v1559_v42 }
0x1daa   :  { %v1577_v56 = vsel %vm1574_vm5, %v1312_v4, 0 }
0x1dab   :  { %v1578_v61 = vsel %vm1467_vm13, %v1577_v56, 0 }
0x1dac   :  { %v1580_v24 = vshrl.u32 %v1578_v61, 16  ;;  %v1579_v62 = vand.u32 65535, %v1578_v61 }
0x1dae   :  { %v1582_v1 = vcvt.s32.f32 %v1580_v24  ;;  %v1581_v23 = vcvt.s32.f32 %v1579_v62 }
0x1db0   :  { %1585 = vadd.xlane.f32.xlu0 %v1582_v1  ;;  %1583 = vadd.xlane.f32.xlu1 %v1581_v23 }
0x1e39   :  { %v1586_v18 = vpop.xlane.xlu0 %1585  ;;  %v1584_v14 = vpop.xlane.xlu1 %1583 }
0x1e3a   :  { %v1588_v6 = vcvt.f32.s32 %v1586_v18  ;;  %v1587_v37 = vcvt.f32.s32 %v1584_v14 }
0x1e3c   :  { %v1589_v31 = vshll.u32 %v1588_v6, 16 }
0x1e3e   :  { %v1590_v17 = vadd.s32 %v1589_v31, %v1587_v37 }
0x1e40   :  { %vm1591_vm14 = vcmp.eq.s32.totalorder %v2058_v10, %v1590_v17  ;;  %v1593_v28 = vsel %vm1592_vm11, %v1590_v17, %v1576_v3 }
0x1e41   :  { %v1594_v33 = vsel %vm1591_vm14, %v1282_v63, 0 }
0x1e42   :  { %v1595_v7 = vsel %vm1467_vm13, %v1594_v33, 0 }
0x1e43   :  { %v1597_v59 = vshrl.u32 %v1595_v7, 16  ;;  %v1596_v27 = vand.u32 65535, %v1595_v7 }
0x1e45   :  { %v1599_v0 = vcvt.s32.f32 %v1597_v59  ;;  %v1598_v21 = vcvt.s32.f32 %v1596_v27 }
0x1e47   :  { %1602 = vadd.xlane.f32.xlu0 %v1599_v0  ;;  %1600 = vadd.xlane.f32.xlu1 %v1598_v21 }
0x1e48   :  { %1919 = shalt.err (!%p1916_p9)
}
0x1e49   :  { %1621 = dma.vmem_to_hbm [thread:$0]  %s1619_s25, 16, %s2622_s3, [#allocation4]   ;;  %vm1608_vm10 = vcmp.eq.s32.totalorder %v2058_v10, 0  ;;  %vm1610_vm13 = vcmask 64519  }
0x1e4a   :  { %s1962_s30 = smov [#allocation6]  }
0x1e4b   :  { %s1628_s5 = sshll.u32 %s1962_s30, 4  ;;  %s1629_s5 = int_to_ptr.vmem [resolvable:$true] %s1628_s5 }
0x1e4c   :  { %s1928_s6 = scalar_lea.vmem %s1629_s5, 16  ;;  %s1932_s7 = scalar_lea.vmem %s1629_s5, 32 }
0x1e4d   :  { %p1929_p10 = scmp.ne.s32.totalorder %s1629_s5, %s1928_s6  ;;  %p1933_p11 = scmp.lt.s32.totalorder %s1629_s5, %s1629_s5 }
0x1e4e   :  { %p1934_p12 = scmp.lt.s32.totalorder %s1932_s7, %s1928_s6 }
0x1e50   :  { %p1935_p13 = por %p1934_p12, %p1933_p11 }
0x1e52   :  { %p1936_p0 = pnand %p1935_p13, %p1929_p10 }
0x1ed0   :  { %v1603_v47 = vpop.xlane.xlu0 %1602  ;;  %v1601_v11 = vpop.xlane.xlu1 %1600 }
0x1ed1   :  { %v1605_v29 = vcvt.f32.s32 %v1603_v47  ;;  %v1604_v32 = vcvt.f32.s32 %v1601_v11 }
0x1ed3   :  { %v1606_v25 = vshll.u32 %v1605_v29, 16 }
0x1ed5   :  { %v1607_v9 = vadd.s32 %v1606_v25, %v1604_v32 }
0x1ed7   :  { %v1609_v34 = vsel %vm1608_vm10, %v1607_v9, %v1593_v28 }
0x1ed8   :  { %1611 = vst.msk [vmem:[#allocation6 - $0x7] sm:$0x80] %vm1610_vm13, %v1609_v34 }
0x1ed9   :  { %1939 = shalt.err (!%p1936_p0)
}
0x1eda   :  { %1631 = dma.vmem_to_hbm [thread:$0]  %s1629_s5, 16, %s2623_s4, [#allocation7]  }
0x1edb   :  { %1950 = dma.done.wait [#allocation4], 16  }
0x1edc   :  { %1951 = vsyncadd [#allocation4], 4294967280 }
0x1edd   :  { %1952 = dma.done.wait [#allocation7], 16  }
0x1ede   :  { %1953 = vsyncadd [#allocation7], 4294967280 }
0x1edf   :  { %1638 = vsyncpa [#allocation3], 1 }
0x1ee0   :  { %1639 = vsyncpa [#allocation4], 1 }
0x1ee1   :  { %1640 = vsyncpa [#allocation7], 1 }

</bundles_post_ra>
